<compile_context>
chip_gen: v7x
topology: tpu7x:2x2x1
jax: 0.10.0
libtpu: 0.0.40
codegen_flags: <defaults>
</compile_context>

<pallas_src>
import jax
import jax.numpy as jnp
from jax import lax
from jax.experimental import pallas as pl
from jax.experimental.pallas import tpu as pltpu


def _interp_matrix(out_size, in_size):
    """Row-interpolation matrix for bilinear resize with align_corners=True."""
    if in_size == 1:
        return jnp.ones((out_size, 1), jnp.float32)
    if out_size == 1:
        pos = jnp.zeros((1,), jnp.float32)
    else:
        pos = jnp.arange(out_size, dtype=jnp.float32) * ((in_size - 1) / (out_size - 1))
    lo = jnp.clip(jnp.floor(pos).astype(jnp.int32), 0, in_size - 2)
    frac = pos - lo.astype(jnp.float32)
    rows = jnp.arange(out_size)
    A = jnp.zeros((out_size, in_size), jnp.float32)
    A = A.at[rows, lo].add(1.0 - frac)
    A = A.at[rows, lo + 1].add(frac)
    return A


def downsample_forward(x, conv_w, bn_gamma, bn_beta, *, kernel_size, group,
                       eps=1e-5, batch_tile=None):
    n, c0, h0, w0 = x.shape
    k = kernel_size
    kk = k * k
    h, w = h0 - k + 1, w0 - k + 1
    L = h * w
    HW0 = h0 * w0
    C = group * kk
    M = c0 * kk
    cpg = c0 // group
    f32 = jnp.float32

    x = x.astype(f32)

    # Batch tile: as many whole images per grid step as fit a modest VMEM
    # budget (review item: batch-tile the grid).  For the test shapes the
    # whole batch fits -> the forward runs in 2 grid steps and the patches
    # block stays VMEM-resident across both phases (single HBM read).
    if batch_tile is None:
        budget = 4 << 20                      # ~4 MiB per patches block (f32)
        batch_tile = 1
        for bt in range(1, n + 1):
            if n % bt == 0 and bt * M * L * 4 <= budget:
                batch_tile = bt
    assert n % batch_tile == 0
    n_tiles = n // batch_tile

    # im2col glue, materialized ONCE in HBM in the exact layout the kernel
    # consumes:  patches[b, ci*kk + ki*k + kj, i*w + j] = x[b, ci, i+ki, j+kj]
    # TODO(synk): build the k*k shifted windows in-kernel straight from x
    # (1/kk of the bytes) once in-kernel minor-dim reshapes are not a
    # lowering risk.
    cols = [x[:, :, ki:ki + h, kj:kj + w] for ki in range(k) for kj in range(k)]
    patches = jnp.stack(cols, axis=2).reshape(n, M, L)

    # On v6e/v7x these operands can be cast to bfloat16 (f32 accumulation in
    # every dot) to halve HBM/VMEM bytes; kept f32 for accuracy at this size.
    w_mat = conv_w.reshape(C, M).astype(f32)
    gam = bn_gamma.reshape(C, 1).astype(f32)
    bet = bn_beta.reshape(C, 1).astype(f32)

    # Constant matmul operands (tiny; avoid in-kernel lane-axis reshapes).
    m_idx = jnp.arange(M)
    # rep[m, c] = 1  iff  c == (channel(m)//cpg)*kk + tap(m)          -> (M, C)
    rep = (jnp.arange(C)[None, :] ==
           (((m_idx // kk) // cpg) * kk + m_idx % kk)[:, None]).astype(f32)
    # sel[ci, m] = 1 iff  m // kk == ci                               -> (c0, M)
    sel = ((m_idx[None, :] // kk) == jnp.arange(c0)[:, None]).astype(f32)
    # Combined bilinear (align_corners=True) interpolation: out = agg @ up.
    # (196, 256) ~ 200 KB here.  For large maps use the separable form.
    ah = _interp_matrix(h0, h)                                        # (h0, h)
    aw = _interp_matrix(w0, w)                                        # (w0, w)
    up = jnp.einsum('Hi,Wj->ijHW', ah, aw).reshape(L, HW0)

    inv_count = 1.0 / float(n * L)            # biased (training-mode) BN stats

    def kernel(p_ref, w_ref, gam_ref, bet_ref, rep_ref, sel_ref, up_ref,
               o_ref, sum_ref, sq_ref):
        ph = pl.program_id(0)                 # 0: batch statistics, 1: apply
        t = pl.program_id(1)                  # batch tile

        @pl.when((ph == 0) & (t == 0))
        def _init():
            sum_ref[...] = jnp.zeros_like(sum_ref)
            sq_ref[...] = jnp.zeros_like(sq_ref)

        @pl.when(ph == 0)
        def _stats():
            # Per-channel sum / sum-of-squares of the raw conv output,
            # accumulated across the whole batch (two-pass BatchNorm).
            # NOTE: E[x^2]-E[x]^2 is fine for these well-scaled activations;
            # use a shifted/compensated accumulation if batch*L grows a lot.
            w_full = w_ref[...]
            for b in range(batch_tile):
                raw = jnp.dot(w_full, p_ref[b],
                              preferred_element_type=jnp.float32)        # (C, L)
                sum_ref[...] += jnp.sum(raw, axis=1, keepdims=True)
                sq_ref[...] += jnp.sum(raw * raw, axis=1, keepdims=True)

        @pl.when(ph == 1)
        def _apply():
            mean = sum_ref[...] * inv_count                              # (C, 1)
            var = sq_ref[...] * inv_count - mean * mean
            scale = gam_ref[...] * lax.rsqrt(var + eps)
            bias = bet_ref[...] - mean * scale
            w_full = w_ref[...]
            rep_m = rep_ref[...]
            sel_m = sel_ref[...]
            up_m = up_ref[...]
            for b in range(batch_tile):
                p = p_ref[b]                                             # (M, L)
                # conv + BatchNorm affine on the conv output
                y = jnp.dot(w_full, p,
                            preferred_element_type=jnp.float32) * scale + bias
                # softmax over channels (exact reciprocal per review)
                mx = jnp.max(y, axis=0, keepdims=True)
                e = jnp.exp(y - mx)
                sigma = e / jnp.sum(e, axis=0, keepdims=True)            # (C, L)
                # per-group sigma -> per-channel rows via replication matmul
                sig_full = jnp.dot(rep_m, sigma,
                                   preferred_element_type=jnp.float32)   # (M, L)
                # weighted sum over the k*k taps via selection matmul
                agg = jnp.dot(sel_m, p * sig_full,
                              preferred_element_type=jnp.float32)        # (c0, L)
                # bilinear upsample as ONE lane-dense (minor dim = 256) matmul
                o_ref[b] = jnp.dot(agg, up_m,
                                   preferred_element_type=jnp.float32)   # (c0, HW0)

    const2 = lambda ph, t: (0, 0)
    out = pl.pallas_call(
        kernel,
        grid=(2, n_tiles),
        in_specs=[
            pl.BlockSpec((batch_tile, M, L), lambda ph, t: (t, 0, 0)),
            pl.BlockSpec((C, M), const2),
            pl.BlockSpec((C, 1), const2),
            pl.BlockSpec((C, 1), const2),
            pl.BlockSpec((M, C), const2),
            pl.BlockSpec((c0, M), const2),
            pl.BlockSpec((L, HW0), const2),
        ],
        # ph*t pins the output block index to 0 during the stats phase so no
        # un-written block is flushed; phase 1 writes block t with real data.
        out_specs=pl.BlockSpec((batch_tile, c0, HW0),
                               lambda ph, t: (ph * t, 0, 0)),
        out_shape=jax.ShapeDtypeStruct((n, c0, HW0), f32),
        scratch_shapes=[pltpu.VMEM((C, 1), f32), pltpu.VMEM((C, 1), f32)],
        compiler_params=pltpu.CompilerParams(
            dimension_semantics=("arbitrary", "arbitrary")),
    )(patches, w_mat, gam, bet, rep, sel, up)

    return out.reshape(n, c0, h0, w0)


def _reference(x, conv_w, bn_gamma, bn_beta, *, kernel_size, group, eps=1e-5):
    """Pure-JAX reference mirroring Downsample.forward (training-mode BN)."""
    n, c0, h0, w0 = x.shape
    k = kernel_size
    kk = k * k
    h, w = h0 - k + 1, w0 - k + 1
    L = h * w
    C = group * kk
    cpg = c0 // group
    cols = [x[:, :, ki:ki + h, kj:kj + w] for ki in range(k) for kj in range(k)]
    patches = jnp.stack(cols, axis=2)
    pflat = patches.reshape(n, c0 * kk, L)
    raw = jnp.einsum('cm,nml->ncl', conv_w.reshape(C, -1), pflat)
    mean = raw.mean(axis=(0, 2), keepdims=True)
    var = ((raw - mean) ** 2).mean(axis=(0, 2), keepdims=True)
    y = (raw - mean) / jnp.sqrt(var + eps) * bn_gamma.reshape(1, C, 1) \
        + bn_beta.reshape(1, C, 1)
    sig = jax.nn.softmax(y, axis=1)
    sig_exp = jnp.repeat(sig.reshape(n, group, kk, L), cpg, axis=1)
    agg = jnp.sum(patches.reshape(n, c0, kk, L) * sig_exp, axis=2).reshape(n, c0, h, w)
    ah = _interp_matrix(h0, h)
    aw = _interp_matrix(w0, w)
    return jnp.einsum('Hh,Ww,nchw->ncHW', ah, aw, agg)


if __name__ == "__main__":
    key = jax.random.PRNGKey(0)
    n, c0, h0, w0 = 2, 8, 16, 16          # x: NCHW
    k, group = 3, 4                        # in_channels divisible by group
    C = group * k * k

    kx, kw = jax.random.split(key)
    x = jax.random.normal(kx, (n, c0, h0, w0), jnp.float32)

    # Conv2d weight (C, c0, k, k), kaiming_normal_(mode='fan_out', relu)
    fan_out = C * k * k
    std = (2.0 / fan_out) ** 0.5
    conv_w = std * jax.random.normal(kw, (C, c0, k, k), jnp.float32)
    # BatchNorm2d default init
    bn_gamma = jnp.ones((C,), jnp.float32)
    bn_beta = jnp.zeros((C,), jnp.float32)

    out = downsample_forward(x, conv_w, bn_gamma, bn_beta,
                             kernel_size=k, group=group)
    out = jax.block_until_ready(out)
    assert out.shape == (n, c0, h0, w0), out.shape

    ref = _reference(x, conv_w, bn_gamma, bn_beta, kernel_size=k, group=group)
    err = float(jnp.max(jnp.abs(out - ref)))
    # Exact softmax reciprocal now -> f32-level agreement (observed ~1e-6).
    assert jnp.allclose(out, ref, atol=1e-3, rtol=1e-3), err

    print("KERNEL_OK")
</pallas_src>

<mosaic_0001>
module attributes {stable_mosaic.version = 11 : i64} {
  func.func @kernel(%arg0: i32, %arg1: i32, %arg2: memref<2x72x196xf32, #tpu.memory_space<vmem>>, %arg3: memref<36x72xf32, #tpu.memory_space<vmem>>, %arg4: memref<36x1xf32, #tpu.memory_space<vmem>>, %arg5: memref<36x1xf32, #tpu.memory_space<vmem>>, %arg6: memref<72x36xf32, #tpu.memory_space<vmem>>, %arg7: memref<8x72xf32, #tpu.memory_space<vmem>>, %arg8: memref<196x256xf32, #tpu.memory_space<vmem>>, %arg9: memref<2x8x256xf32, #tpu.memory_space<vmem>>, %arg10: memref<36x1xf32, #tpu.memory_space<vmem>>, %arg11: memref<36x1xf32, #tpu.memory_space<vmem>>) attributes {dimension_semantics = [#tpu.dimension_semantics<arbitrary>, #tpu.dimension_semantics<arbitrary>], iteration_bounds = array<i64: 2, 1>, scalar_prefetch = 0 : i64, scratch_operands = 2 : i64, tpu.core_type = #tpu.core_type<tc>, window_params = [{transform_indices = @transform_0, window_bounds = array<i64: 2, 72, 196>}, {pipeline_mode = #tpu.pipeline_mode<synchronous>, transform_indices = @transform_1, window_bounds = array<i64: 36, 72>}, {pipeline_mode = #tpu.pipeline_mode<synchronous>, transform_indices = @transform_2, window_bounds = array<i64: 36, 1>}, {pipeline_mode = #tpu.pipeline_mode<synchronous>, transform_indices = @transform_3, window_bounds = array<i64: 36, 1>}, {pipeline_mode = #tpu.pipeline_mode<synchronous>, transform_indices = @transform_4, window_bounds = array<i64: 72, 36>}, {pipeline_mode = #tpu.pipeline_mode<synchronous>, transform_indices = @transform_5, window_bounds = array<i64: 8, 72>}, {pipeline_mode = #tpu.pipeline_mode<synchronous>, transform_indices = @transform_6, window_bounds = array<i64: 196, 256>}, {transform_indices = @transform_7, window_bounds = array<i64: 2, 8, 256>}]} {
    %c0_i32 = arith.constant 0 : i32
    %0 = arith.cmpi eq, %arg0, %c0_i32 : i32
    %c0_i32_0 = arith.constant 0 : i32
    %1 = arith.cmpi eq, %arg1, %c0_i32_0 : i32
    %2 = arith.andi %0, %1 : i1
    %3 = arith.extui %2 : i1 to i32
    %c0_i32_1 = arith.constant 0 : i32
    %4 = arith.cmpi ne, %3, %c0_i32_1 : i32
    scf.if %4 {
      %cst = arith.constant 0.000000e+00 : f32
      %11 = vector.broadcast %cst : f32 to vector<36x1xf32>
      %c0 = arith.constant 0 : index
      %c0_5 = arith.constant 0 : index
      %12 = vector.load %arg10[%c0, %c0_5] : memref<36x1xf32, #tpu.memory_space<vmem>>, vector<36x1xf32>
      tpu.vector_store %arg10[%c0, %c0_5], %11 {strides = array<i32>} : memref<36x1xf32, #tpu.memory_space<vmem>>, vector<36x1xf32>,
      %cst_6 = arith.constant 0.000000e+00 : f32
      %13 = vector.broadcast %cst_6 : f32 to vector<36x1xf32>
      %c0_7 = arith.constant 0 : index
      %c0_8 = arith.constant 0 : index
      %14 = vector.load %arg11[%c0_7, %c0_8] : memref<36x1xf32, #tpu.memory_space<vmem>>, vector<36x1xf32>
      tpu.vector_store %arg11[%c0_7, %c0_8], %13 {strides = array<i32>} : memref<36x1xf32, #tpu.memory_space<vmem>>, vector<36x1xf32>,
    } else {
    }
    %c0_i32_2 = arith.constant 0 : i32
    %5 = arith.cmpi eq, %arg0, %c0_i32_2 : i32
    %6 = arith.extui %5 : i1 to i32
    %c0_i32_3 = arith.constant 0 : i32
    %7 = arith.cmpi ne, %6, %c0_i32_3 : i32
    scf.if %7 {
      %c0 = arith.constant 0 : index
      %c0_5 = arith.constant 0 : index
      %11 = vector.load %arg3[%c0, %c0_5] : memref<36x72xf32, #tpu.memory_space<vmem>>, vector<36x72xf32>
      %c0_6 = arith.constant 0 : index
      %c0_7 = arith.constant 0 : index
      %c0_8 = arith.constant 0 : index
      %12 = vector.load %arg2[%c0_6, %c0_7, %c0_8] : memref<2x72x196xf32, #tpu.memory_space<vmem>>, vector<1x72x196xf32>
      %13 = vector.shape_cast %12 : vector<1x72x196xf32> to vector<72x196xf32>
      %cst = arith.constant dense<0.000000e+00> : vector<36x196xf32>
      %14 = tpu.matmul %11, %13, %cst {dimension_numbers = #tpu.dot_dimension_numbers<[1], [0], [0], [1], [0, 0, 1, 1], [], []>} : vector<36x72xf32>, vector<72x196xf32>, vector<36x196xf32> -> vector<36x196xf32>
      %c0_9 = arith.constant 0 : index
      %c0_10 = arith.constant 0 : index
      %15 = vector.load %arg10[%c0_9, %c0_10] : memref<36x1xf32, #tpu.memory_space<vmem>>, vector<36x1xf32>
      %cst_11 = arith.constant dense<0.000000e+00> : vector<36xf32>
      %16 = vector.multi_reduction <add>, %14, %cst_11 [1] : vector<36x196xf32> to vector<36xf32>
      %17 = vector.shape_cast %16 : vector<36xf32> to vector<36x1xf32>
      %18 = arith.addf %15, %17 : vector<36x1xf32>
      %c0_12 = arith.constant 0 : index
      %c0_13 = arith.constant 0 : index
      %19 = vector.load %arg10[%c0_12, %c0_13] : memref<36x1xf32, #tpu.memory_space<vmem>>, vector<36x1xf32>
      tpu.vector_store %arg10[%c0_12, %c0_13], %18 {strides = array<i32>} : memref<36x1xf32, #tpu.memory_space<vmem>>, vector<36x1xf32>,
      %c0_14 = arith.constant 0 : index
      %c0_15 = arith.constant 0 : index
      %20 = vector.load %arg11[%c0_14, %c0_15] : memref<36x1xf32, #tpu.memory_space<vmem>>, vector<36x1xf32>
      %21 = arith.mulf %14, %14 : vector<36x196xf32>
      %cst_16 = arith.constant dense<0.000000e+00> : vector<36xf32>
      %22 = vector.multi_reduction <add>, %21, %cst_16 [1] : vector<36x196xf32> to vector<36xf32>
      %23 = vector.shape_cast %22 : vector<36xf32> to vector<36x1xf32>
      %24 = arith.addf %20, %23 : vector<36x1xf32>
      %c0_17 = arith.constant 0 : index
      %c0_18 = arith.constant 0 : index
      %25 = vector.load %arg11[%c0_17, %c0_18] : memref<36x1xf32, #tpu.memory_space<vmem>>, vector<36x1xf32>
      tpu.vector_store %arg11[%c0_17, %c0_18], %24 {strides = array<i32>} : memref<36x1xf32, #tpu.memory_space<vmem>>, vector<36x1xf32>,
      %c1 = arith.constant 1 : index
      %c0_19 = arith.constant 0 : index
      %c0_20 = arith.constant 0 : index
      %26 = vector.load %arg2[%c1, %c0_19, %c0_20] : memref<2x72x196xf32, #tpu.memory_space<vmem>>, vector<1x72x196xf32>
      %27 = vector.shape_cast %26 : vector<1x72x196xf32> to vector<72x196xf32>
      %cst_21 = arith.constant dense<0.000000e+00> : vector<36x196xf32>
      %28 = tpu.matmul %11, %27, %cst_21 {dimension_numbers = #tpu.dot_dimension_numbers<[1], [0], [0], [1], [0, 0, 1, 1], [], []>} : vector<36x72xf32>, vector<72x196xf32>, vector<36x196xf32> -> vector<36x196xf32>
      %c0_22 = arith.constant 0 : index
      %c0_23 = arith.constant 0 : index
      %29 = vector.load %arg10[%c0_22, %c0_23] : memref<36x1xf32, #tpu.memory_space<vmem>>, vector<36x1xf32>
      %cst_24 = arith.constant dense<0.000000e+00> : vector<36xf32>
      %30 = vector.multi_reduction <add>, %28, %cst_24 [1] : vector<36x196xf32> to vector<36xf32>
      %31 = vector.shape_cast %30 : vector<36xf32> to vector<36x1xf32>
      %32 = arith.addf %29, %31 : vector<36x1xf32>
      %c0_25 = arith.constant 0 : index
      %c0_26 = arith.constant 0 : index
      %33 = vector.load %arg10[%c0_25, %c0_26] : memref<36x1xf32, #tpu.memory_space<vmem>>, vector<36x1xf32>
      tpu.vector_store %arg10[%c0_25, %c0_26], %32 {strides = array<i32>} : memref<36x1xf32, #tpu.memory_space<vmem>>, vector<36x1xf32>,
      %c0_27 = arith.constant 0 : index
      %c0_28 = arith.constant 0 : index
      %34 = vector.load %arg11[%c0_27, %c0_28] : memref<36x1xf32, #tpu.memory_space<vmem>>, vector<36x1xf32>
      %35 = arith.mulf %28, %28 : vector<36x196xf32>
      %cst_29 = arith.constant dense<0.000000e+00> : vector<36xf32>
      %36 = vector.multi_reduction <add>, %35, %cst_29 [1] : vector<36x196xf32> to vector<36xf32>
      %37 = vector.shape_cast %36 : vector<36xf32> to vector<36x1xf32>
      %38 = arith.addf %34, %37 : vector<36x1xf32>
      %c0_30 = arith.constant 0 : index
      %c0_31 = arith.constant 0 : index
      %39 = vector.load %arg11[%c0_30, %c0_31] : memref<36x1xf32, #tpu.memory_space<vmem>>, vector<36x1xf32>
      tpu.vector_store %arg11[%c0_30, %c0_31], %38 {strides = array<i32>} : memref<36x1xf32, #tpu.memory_space<vmem>>, vector<36x1xf32>,
    } else {
    }
    %c1_i32 = arith.constant 1 : i32
    %8 = arith.cmpi eq, %arg0, %c1_i32 : i32
    %9 = arith.extui %8 : i1 to i32
    %c0_i32_4 = arith.constant 0 : i32
    %10 = arith.cmpi ne, %9, %c0_i32_4 : i32
    scf.if %10 {
      %c0 = arith.constant 0 : index
      %c0_5 = arith.constant 0 : index
      %11 = vector.load %arg10[%c0, %c0_5] : memref<36x1xf32, #tpu.memory_space<vmem>>, vector<36x1xf32>
      %cst = arith.constant 0.00255102036 : f32
      %12 = vector.broadcast %cst : f32 to vector<36x1xf32>
      %13 = arith.mulf %11, %12 : vector<36x1xf32>
      %c0_6 = arith.constant 0 : index
      %c0_7 = arith.constant 0 : index
      %14 = vector.load %arg11[%c0_6, %c0_7] : memref<36x1xf32, #tpu.memory_space<vmem>>, vector<36x1xf32>
      %cst_8 = arith.constant 0.00255102036 : f32
      %15 = vector.broadcast %cst_8 : f32 to vector<36x1xf32>
      %16 = arith.mulf %14, %15 : vector<36x1xf32>
      %17 = arith.mulf %13, %13 : vector<36x1xf32>
      %18 = arith.subf %16, %17 : vector<36x1xf32>
      %c0_9 = arith.constant 0 : index
      %c0_10 = arith.constant 0 : index
      %19 = vector.load %arg4[%c0_9, %c0_10] : memref<36x1xf32, #tpu.memory_space<vmem>>, vector<36x1xf32>
      %cst_11 = arith.constant 9.99999974E-6 : f32
      %20 = vector.broadcast %cst_11 : f32 to vector<36x1xf32>
      %21 = arith.addf %18, %20 : vector<36x1xf32>
      %22 = math.rsqrt %21 : vector<36x1xf32>
      %23 = arith.mulf %19, %22 : vector<36x1xf32>
      %c0_12 = arith.constant 0 : index
      %c0_13 = arith.constant 0 : index
      %24 = vector.load %arg5[%c0_12, %c0_13] : memref<36x1xf32, #tpu.memory_space<vmem>>, vector<36x1xf32>
      %25 = arith.mulf %13, %23 : vector<36x1xf32>
      %26 = arith.subf %24, %25 : vector<36x1xf32>
      %c0_14 = arith.constant 0 : index
      %c0_15 = arith.constant 0 : index
      %27 = vector.load %arg3[%c0_14, %c0_15] : memref<36x72xf32, #tpu.memory_space<vmem>>, vector<36x72xf32>
      %c0_16 = arith.constant 0 : index
      %c0_17 = arith.constant 0 : index
      %28 = vector.load %arg6[%c0_16, %c0_17] : memref<72x36xf32, #tpu.memory_space<vmem>>, vector<72x36xf32>
      %c0_18 = arith.constant 0 : index
      %c0_19 = arith.constant 0 : index
      %29 = vector.load %arg7[%c0_18, %c0_19] : memref<8x72xf32, #tpu.memory_space<vmem>>, vector<8x72xf32>
      %c0_20 = arith.constant 0 : index
      %c0_21 = arith.constant 0 : index
      %30 = vector.load %arg8[%c0_20, %c0_21] : memref<196x256xf32, #tpu.memory_space<vmem>>, vector<196x256xf32>
      %c0_22 = arith.constant 0 : index
      %c0_23 = arith.constant 0 : index
      %c0_24 = arith.constant 0 : index
      %31 = vector.load %arg2[%c0_22, %c0_23, %c0_24] : memref<2x72x196xf32, #tpu.memory_space<vmem>>, vector<1x72x196xf32>
      %32 = vector.shape_cast %31 : vector<1x72x196xf32> to vector<72x196xf32>
      %cst_25 = arith.constant dense<0.000000e+00> : vector<36x196xf32>
      %33 = tpu.matmul %27, %32, %cst_25 {dimension_numbers = #tpu.dot_dimension_numbers<[1], [0], [0], [1], [0, 0, 1, 1], [], []>} : vector<36x72xf32>, vector<72x196xf32>, vector<36x196xf32> -> vector<36x196xf32>
      %34 = vector.broadcast %23 : vector<36x1xf32> to vector<36x196xf32>
      %35 = arith.mulf %33, %34 : vector<36x196xf32>
      %36 = vector.broadcast %26 : vector<36x1xf32> to vector<36x196xf32>
      %37 = arith.addf %35, %36 : vector<36x196xf32>
      %cst_26 = arith.constant dense<0xFF800000> : vector<196xf32>
      %38 = vector.multi_reduction <maximumf>, %37, %cst_26 [0] : vector<36x196xf32> to vector<196xf32>
      %39 = vector.shape_cast %38 : vector<196xf32> to vector<1x196xf32>
      %40 = vector.broadcast %39 : vector<1x196xf32> to vector<36x196xf32>
      %41 = arith.subf %37, %40 : vector<36x196xf32>
      %42 = math.exp %41 : vector<36x196xf32>
      %cst_27 = arith.constant dense<0.000000e+00> : vector<196xf32>
      %43 = vector.multi_reduction <add>, %42, %cst_27 [0] : vector<36x196xf32> to vector<196xf32>
      %44 = vector.shape_cast %43 : vector<196xf32> to vector<1x196xf32>
      %45 = vector.broadcast %44 : vector<1x196xf32> to vector<36x196xf32>
      %46 = arith.divf %42, %45 : vector<36x196xf32>
      %cst_28 = arith.constant dense<0.000000e+00> : vector<72x196xf32>
      %47 = tpu.matmul %28, %46, %cst_28 {dimension_numbers = #tpu.dot_dimension_numbers<[1], [0], [0], [1], [0, 0, 1, 1], [], []>} : vector<72x36xf32>, vector<36x196xf32>, vector<72x196xf32> -> vector<72x196xf32>
      %48 = arith.mulf %32, %47 : vector<72x196xf32>
      %cst_29 = arith.constant dense<0.000000e+00> : vector<8x196xf32>
      %49 = tpu.matmul %29, %48, %cst_29 {dimension_numbers = #tpu.dot_dimension_numbers<[1], [0], [0], [1], [0, 0, 1, 1], [], []>} : vector<8x72xf32>, vector<72x196xf32>, vector<8x196xf32> -> vector<8x196xf32>
      %cst_30 = arith.constant dense<0.000000e+00> : vector<8x256xf32>
      %50 = tpu.matmul %49, %30, %cst_30 {dimension_numbers = #tpu.dot_dimension_numbers<[1], [0], [0], [1], [0, 0, 1, 1], [], []>} : vector<8x196xf32>, vector<196x256xf32>, vector<8x256xf32> -> vector<8x256xf32>
      %c0_31 = arith.constant 0 : index
      %c0_32 = arith.constant 0 : index
      %c0_33 = arith.constant 0 : index
      %51 = vector.load %arg9[%c0_31, %c0_32, %c0_33] : memref<2x8x256xf32, #tpu.memory_space<vmem>>, vector<1x8x256xf32>
      %52 = vector.shape_cast %51 : vector<1x8x256xf32> to vector<8x256xf32>
      %53 = vector.shape_cast %50 : vector<8x256xf32> to vector<1x8x256xf32>
      tpu.vector_store %arg9[%c0_31, %c0_32, %c0_33], %53 {strides = array<i32>} : memref<2x8x256xf32, #tpu.memory_space<vmem>>, vector<1x8x256xf32>,
      %c1 = arith.constant 1 : index
      %c0_34 = arith.constant 0 : index
      %c0_35 = arith.constant 0 : index
      %54 = vector.load %arg2[%c1, %c0_34, %c0_35] : memref<2x72x196xf32, #tpu.memory_space<vmem>>, vector<1x72x196xf32>
      %55 = vector.shape_cast %54 : vector<1x72x196xf32> to vector<72x196xf32>
      %cst_36 = arith.constant dense<0.000000e+00> : vector<36x196xf32>
      %56 = tpu.matmul %27, %55, %cst_36 {dimension_numbers = #tpu.dot_dimension_numbers<[1], [0], [0], [1], [0, 0, 1, 1], [], []>} : vector<36x72xf32>, vector<72x196xf32>, vector<36x196xf32> -> vector<36x196xf32>
      %57 = vector.broadcast %23 : vector<36x1xf32> to vector<36x196xf32>
      %58 = arith.mulf %56, %57 : vector<36x196xf32>
      %59 = vector.broadcast %26 : vector<36x1xf32> to vector<36x196xf32>
      %60 = arith.addf %58, %59 : vector<36x196xf32>
      %cst_37 = arith.constant dense<0xFF800000> : vector<196xf32>
      %61 = vector.multi_reduction <maximumf>, %60, %cst_37 [0] : vector<36x196xf32> to vector<196xf32>
      %62 = vector.shape_cast %61 : vector<196xf32> to vector<1x196xf32>
      %63 = vector.broadcast %62 : vector<1x196xf32> to vector<36x196xf32>
      %64 = arith.subf %60, %63 : vector<36x196xf32>
      %65 = math.exp %64 : vector<36x196xf32>
      %cst_38 = arith.constant dense<0.000000e+00> : vector<196xf32>
      %66 = vector.multi_reduction <add>, %65, %cst_38 [0] : vector<36x196xf32> to vector<196xf32>
      %67 = vector.shape_cast %66 : vector<196xf32> to vector<1x196xf32>
      %68 = vector.broadcast %67 : vector<1x196xf32> to vector<36x196xf32>
      %69 = arith.divf %65, %68 : vector<36x196xf32>
      %cst_39 = arith.constant dense<0.000000e+00> : vector<72x196xf32>
      %70 = tpu.matmul %28, %69, %cst_39 {dimension_numbers = #tpu.dot_dimension_numbers<[1], [0], [0], [1], [0, 0, 1, 1], [], []>} : vector<72x36xf32>, vector<36x196xf32>, vector<72x196xf32> -> vector<72x196xf32>
      %71 = arith.mulf %55, %70 : vector<72x196xf32>
      %cst_40 = arith.constant dense<0.000000e+00> : vector<8x196xf32>
      %72 = tpu.matmul %29, %71, %cst_40 {dimension_numbers = #tpu.dot_dimension_numbers<[1], [0], [0], [1], [0, 0, 1, 1], [], []>} : vector<8x72xf32>, vector<72x196xf32>, vector<8x196xf32> -> vector<8x196xf32>
      %cst_41 = arith.constant dense<0.000000e+00> : vector<8x256xf32>
      %73 = tpu.matmul %72, %30, %cst_41 {dimension_numbers = #tpu.dot_dimension_numbers<[1], [0], [0], [1], [0, 0, 1, 1], [], []>} : vector<8x196xf32>, vector<196x256xf32>, vector<8x256xf32> -> vector<8x256xf32>
      %c1_42 = arith.constant 1 : index
      %c0_43 = arith.constant 0 : index
      %c0_44 = arith.constant 0 : index
      %74 = vector.load %arg9[%c1_42, %c0_43, %c0_44] : memref<2x8x256xf32, #tpu.memory_space<vmem>>, vector<1x8x256xf32>
      %75 = vector.shape_cast %74 : vector<1x8x256xf32> to vector<8x256xf32>
      %76 = vector.shape_cast %73 : vector<8x256xf32> to vector<1x8x256xf32>
      tpu.vector_store %arg9[%c1_42, %c0_43, %c0_44], %76 {strides = array<i32>} : memref<2x8x256xf32, #tpu.memory_space<vmem>>, vector<1x8x256xf32>,
    } else {
    }
    return
  }
  func.func @transform_0(%arg0: i32, %arg1: i32) -> (i32, i32, i32) {
    %c0_i32 = arith.constant 0 : i32
    %c0_i32_0 = arith.constant 0 : i32
    %c0_i32_1 = arith.constant 0 : i32
    return %arg1, %c0_i32, %c0_i32_0 : i32, i32, i32
  }
  func.func @transform_1(%arg0: i32, %arg1: i32) -> (i32, i32) {
    %c0_i32 = arith.constant 0 : i32
    %c0_i32_0 = arith.constant 0 : i32
    %c0_i32_1 = arith.constant 0 : i32
    return %c0_i32, %c0_i32_0 : i32, i32
  }
  func.func @transform_2(%arg0: i32, %arg1: i32) -> (i32, i32) {
    %c0_i32 = arith.constant 0 : i32
    %c0_i32_0 = arith.constant 0 : i32
    %c0_i32_1 = arith.constant 0 : i32
    return %c0_i32, %c0_i32_0 : i32, i32
  }
  func.func @transform_3(%arg0: i32, %arg1: i32) -> (i32, i32) {
    %c0_i32 = arith.constant 0 : i32
    %c0_i32_0 = arith.constant 0 : i32
    %c0_i32_1 = arith.constant 0 : i32
    return %c0_i32, %c0_i32_0 : i32, i32
  }
  func.func @transform_4(%arg0: i32, %arg1: i32) -> (i32, i32) {
    %c0_i32 = arith.constant 0 : i32
    %c0_i32_0 = arith.constant 0 : i32
    %c0_i32_1 = arith.constant 0 : i32
    return %c0_i32, %c0_i32_0 : i32, i32
  }
  func.func @transform_5(%arg0: i32, %arg1: i32) -> (i32, i32) {
    %c0_i32 = arith.constant 0 : i32
    %c0_i32_0 = arith.constant 0 : i32
    %c0_i32_1 = arith.constant 0 : i32
    return %c0_i32, %c0_i32_0 : i32, i32
  }
  func.func @transform_6(%arg0: i32, %arg1: i32) -> (i32, i32) {
    %c0_i32 = arith.constant 0 : i32
    %c0_i32_0 = arith.constant 0 : i32
    %c0_i32_1 = arith.constant 0 : i32
    return %c0_i32, %c0_i32_0 : i32, i32
  }
  func.func @transform_7(%arg0: i32, %arg1: i32) -> (i32, i32, i32) {
    %0 = arith.muli %arg0, %arg1 : i32
    %c0_i32 = arith.constant 0 : i32
    %c0_i32_0 = arith.constant 0 : i32
    %c0_i32_1 = arith.constant 0 : i32
    return %0, %c0_i32, %c0_i32_0 : i32, i32, i32
  }
}

</mosaic_0001>

<bundles_post_ra>
// kernel: tpu_custom_call.1
= control target key start
LH: loop header
LB: loop body
LE: loop exit
PB: predicated region body
PF: predicated region fallthrough
CT: control target
= control target key end

     0   :  { %12 = vsyncpa [#allocation5], 0  ;;  %s3484_s0 = inlined_call_operand.hbm [shape: f32[2,72,196], index: 0, kind: input, shape index: {}]   ;;  %s3485_s1 = inlined_call_operand.vmem [shape: f32[36,72], index: 1, kind: input, shape index: {}]   ;;  %s3486_s2 = inlined_call_operand.vmem [shape: f32[36,1], index: 2, kind: input, shape index: {}]   ;;  %s3487_s3 = inlined_call_operand.vmem [shape: f32[36,1], index: 3, kind: input, shape index: {}]   ;;  %s3488_s4 = inlined_call_operand.vmem [shape: f32[72,36], index: 4, kind: input, shape index: {}]   ;;  %s3489_s5 = inlined_call_operand.vmem [shape: f32[8,72], index: 5, kind: input, shape index: {}]   ;;  %s3490_s6 = inlined_call_operand.hbm [shape: f32[196,256], index: 6, kind: input, shape index: {}]   ;;  %s3491_s7 = inlined_call_operand.hbm [shape: f32[2,8,256], index: 7, kind: output, shape index: {}]  }
   0x1   :  { %13 = vsyncpa [#allocation8], 0 }
   0x2   :  { %14 = vsyncpa [#allocation6], 0 }
   0x3   :  { %16 = vsyncpa [#allocation6 + $0x1], 0  ;;  %s2695_s24 = smov 0   ;;  %s2697_s25 = smov 0  }
   0x4   :  { %s2699_s26 = smov 0  }
   0x5 LB: > { %s2125_s27 = sadd.s32 4294967295, %s2642_s26   ;;  %s2126_s28 = sadd.s32 4294967294, %s2642_s26   ;;  %s2642_s26 = sphi %s2699_s26, %s22_s26   ;;  %s2638_s25 = sphi %s2697_s25, %s3599_s25   ;;  %s2634_s24 = sphi %s2695_s24, %s3598_s24  }
   0x6   : > { %s34_s29 = sadd.s32 1, %s2638_s25  ;;  %p2127_p0 = scmp.ge.s32.totalorder %s2642_s26, 1 }
   0x7   : > { %p36_p1 = scmp.ge.s32.totalorder %s34_s29, 2  ;;  %p219_p2 = scmp.lt.s32.totalorder %s2642_s26, 3 }
   0x8   : > { %p2717_p3 = scmp.eq.s32.totalorder %s2125_s27, 0  ;;  %s2644_s9 = smov [#allocation4]  }
   0x9   : > { %s3601_s29 = smov (%p36_p1, %s34_s29), 0  ;;  %p2723_p4 = pnand %p2127_p0, %p219_p2 }
   0xa   : > { %s3531_s30 = scalar_select %p2717_p3, 1, 0 }
   0xb   : > { %s3532_s8 = scalar_select %p2723_p4, 1, 0 }
   0xc   : > { %s235_s10 = sshll.u32 %s2644_s9, 4  ;;  %p2413_p5 = pneg %p2723_p4  ;;  %s236_s10 = int_to_ptr.vmem [resolvable:$true] %s235_s10 }
   0xd   : > { %s2645_s12 = smov [#allocation7]   ;;  %s2526_s16 = scalar_lea.hbm %s3484_s0, 4608 }
   0xe   : > { %p2731_p6 = pnand %p2717_p3, %p2413_p5  ;;  %s263_s13 = sshll.u32 %s2645_s12, 4  ;;  %s2735_s13 = int_to_ptr.vmem [resolvable:$true] %s263_s13 }
   0xf   : > { %p2527_p7 = scmp.ne.s32.totalorder %s3484_s0, %s2526_s16  ;;  %p2533_p11 = scmp.lt.u32.totalorder %s2526_s16, %s3484_s0 }
  0x10   : > { %p2528_p8 = pneg %p2731_p6 }
  0x12   : > { %p2529_p9 = pnand %p2528_p8, %p2527_p7 }
  0x14   : > { %p2530_p10 = pneg %p2529_p9 }
  0x16   : > { %p2535_p12 = pnand %p2533_p11, %p2530_p10 }
  0x18   : > { %2538 = shalt.err (!%p2535_p12)
}
  0x19   : > { %s2539_s21 = scalar_lea.vmem %s236_s10, 4608  ;;  %p2547_p2 = scmp.lt.s32.totalorder %s236_s10, %s236_s10 }
  0x1a   : > { %p2540_p13 = scmp.ne.s32.totalorder %s236_s10, %s2539_s21  ;;  %p2548_p5 = scmp.lt.s32.totalorder %s2539_s21, %s2539_s21 }
  0x1c   : > { %p2542_p0 = pnand %p2540_p13, %p2528_p8  ;;  %p2549_p3 = por %p2548_p5, %p2547_p2 }
  0x1e   : > { %p2543_p1 = pneg %p2542_p0 }
  0x20   : > { %p2550_p4 = pnand %p2549_p3, %p2543_p1 }
  0x22   : > { %2553 = shalt.err (!%p2550_p4)
}
  0x23   : > { %s2646_s22 = smov 256   ;;  %s2647_s23 = smov 16  }
  0x24   : > { %2416 = dma.hbm_to_vmem [thread:$0]  (!%p2731_p6), %s3484_s0, 4608, %s236_s10, [#allocation5], %s2646_s22, %s2646_s22, %s2647_s23  }
  0x25   : > { %s2554_s16 = scalar_lea.hbm %s3490_s6, 6400 }
  0x26   : > { %p2555_p7 = scmp.ne.s32.totalorder %s3490_s6, %s2554_s16  ;;  %p2561_p9 = scmp.lt.u32.totalorder %s2554_s16, %s3490_s6 }
  0x28   : > { %p2557_p3 = pnand %p2555_p7, %p2528_p8 }
  0x2a   : > { %p2558_p4 = pneg %p2557_p3 }
  0x2c   : > { %p2563_p10 = pnand %p2561_p9, %p2558_p4 }
  0x2e   : > { %2566 = shalt.err (!%p2563_p10)
}
  0x2f   : > { %s2567_s10 = scalar_lea.vmem %s2735_s13, 6400  ;;  %p2575_p0 = scmp.lt.s32.totalorder %s2735_s13, %s2735_s13 }
  0x30   : > { %p2568_p11 = scmp.ne.s32.totalorder %s2735_s13, %s2567_s10  ;;  %p2576_p1 = scmp.lt.s32.totalorder %s2567_s10, %s2567_s10 }
  0x32   : > { %p2570_p12 = pnand %p2568_p11, %p2528_p8  ;;  %p2577_p2 = por %p2576_p1, %p2575_p0 }
  0x34   : > { %p2571_p13 = pneg %p2570_p12 }
  0x36   : > { %p2578_p5 = pnand %p2577_p2, %p2571_p13 }
  0x38   : > { %2581 = shalt.err (!%p2578_p5)
}
  0x39   : > { %2419 = dma.hbm_to_vmem [thread:$0]  (!%p2731_p6), %s3490_s6, 6400, %s2735_s13, [#allocation8], %s2646_s22, %s2646_s22, %s2647_s23  }
  0x3a   : > { %p3534_p7 = scmp.ne.s32.totalorder %s3532_s8, 0 }
  0x3b   : > { %p3535_p3 = scmp.ne.s32.totalorder (!%p3534_p7), %s3531_s30, 0 }
  0x3c   : > { %279 = sbr.rel (%p3534_p7) target bundleno = 2135 (0x857), region = 48 }
  0x43   : > { %2621 = dma.done.wait (%p3535_p3), [#allocation5], 4608  }
  0x44   : > { %2623 = vsyncadd (%p3535_p3), [#allocation5], 4294962688 }
  0x45   : > { %2625 = dma.done.wait (%p3535_p3), [#allocation8], 6400  }
  0x46   : > { %2627 = vsyncadd (%p3535_p3), [#allocation8], 4294960896  ;;  %p313_p8 = scmp.eq.s32.totalorder %s2634_s24, 0 }
  0x47   : > { %vm319_vm0 = vcmask (%p313_p8), 7168   ;;  %vm324_vm1 = vcmask (%p313_p8), 3072   ;;  %v2648_v0 = vmov (%p313_p8), 0.0  }
  0x48   : > { %318 = sbr.rel (!%p313_p8) target bundleno = 79 (0x4f), region = 60  ;;  %320 = vst.msk [vmem:[#allocation2] sm:$0xff] (%p313_p8), %vm319_vm0, %v2648_v0  ;;  %321 = vst.msk [vmem:[#allocation2 + $0x8] sm:$0xff] (%p313_p8), %vm319_vm0, %v2648_v0 }
  0x49   : > { %322 = vst.msk [vmem:[#allocation2 + $0x10] sm:$0xff] (%p313_p8), %vm319_vm0, %v2648_v0  ;;  %323 = vst.msk [vmem:[#allocation2 + $0x18] sm:$0xff] (%p313_p8), %vm319_vm0, %v2648_v0 }
  0x4a   : > { %326 = vst.msk [vmem:[#allocation3] sm:$0xff] (%p313_p8), %vm319_vm0, %v2648_v0  ;;  %327 = vst.msk [vmem:[#allocation3 + $0x8] sm:$0xff] (%p313_p8), %vm319_vm0, %v2648_v0 }
  0x4b   : > { %328 = vst.msk [vmem:[#allocation3 + $0x10] sm:$0xff] (%p313_p8), %vm319_vm0, %v2648_v0  ;;  %329 = vst.msk [vmem:[#allocation3 + $0x18] sm:$0xff] (%p313_p8), %vm319_vm0, %v2648_v0 }
  0x4c   : > { %325 = vst.msk [vmem:[#allocation2 + $0x20] sm:$0xf] (%p313_p8), %vm324_vm1, %v2648_v0  ;;  %330 = vst.msk [vmem:[#allocation3 + $0x20] sm:$0xf] (%p313_p8), %vm324_vm1, %v2648_v0 }
  0x4f PF: > { %p2134_p6 = scmp.ne.s32.totalorder %s2634_s24, 0 }
  0x50   : > { %v340_v1 = vld [vmem:[#allocation4 + $0x8] sm:$0xff] (!%p2134_p6)  ;;  %v342_v2 = vld [vmem:[#allocation4 + $0x18] sm:$0xff] (!%p2134_p6)  ;;  %v339_v6 = vld [vmem:[#allocation4] sm:$0xff] (!%p2134_p6)  ;;  %v2649_v8 = vmov (!%p2134_p6), 0.0   ;;  %vm357_vm2 = vcmask (!%p2134_p6), 588800   ;;  %vm473_vm3 = vcmask (!%p2134_p6), 556032  }
  0x51   : > { %333 = sbr.rel (%p2134_p6) target bundleno = 500 (0x1f4), region = 64  ;;  %v557_v3 = vld [vmem:[#allocation4 + $0x98] sm:$0xff] (!%p2134_p6)  ;;  %v2193_v4 = vpack.c.bf16 (!%p2134_p6), %v342_v2, %v340_v1  ;;  %v559_v5 = vld [vmem:[#allocation4 + $0xa8] sm:$0xff] (!%p2134_p6)  ;;  %v341_v7 = vld [vmem:[#allocation4 + $0x10] sm:$0xff] (!%p2134_p6)  ;;  %437 = vmatprep.mubr.f32.mxu0 (!%p2134_p6), %v2649_v8  ;;  %638 = vmatprep.mubr.f32.mxu1 (!%p2134_p6), %v2649_v8  ;;  %vm490_vm4 = vcmask (!%p2134_p6), 1043456   ;;  %vm492_vm5 = vcmask (!%p2134_p6), 551936  }
  0x52   : > { %v2209_v9 = vpack.c.bf16 (!%p2134_p6), %v559_v5, %v557_v3  ;;  %v2195_v10 = vpack.c.bf16 (!%p2134_p6), %v341_v7, %v339_v6  ;;  %v556_v11 = vld [vmem:[#allocation4 + $0x90] sm:$0xff] (!%p2134_p6)  ;;  %v558_v12 = vld [vmem:[#allocation4 + $0xa0] sm:$0xff] (!%p2134_p6)  ;;  %v344_v13 = vld [vmem:[#allocation4 + $0x28] sm:$0xff] (!%p2134_p6)  ;;  %vm502_vm6 = vcmask (!%p2134_p6), 7168   ;;  %vm507_vm7 = vcmask (!%p2134_p6), 3072  }
  0x53   : > { %2194 = vmatprep.subr.bf16.mxu0 (!%p2134_p6), %v2193_v4  ;;  %v2211_v14 = vpack.c.bf16 (!%p2134_p6), %v558_v12, %v556_v11  ;;  %v346_v15 = vld [vmem:[#allocation4 + $0x38] sm:$0xff] (!%p2134_p6)  ;;  %v563_v17 = vld [vmem:[#allocation4 + $0xc8] sm:$0xff] (!%p2134_p6)  ;;  %v343_v20 = vld [vmem:[#allocation4 + $0x20] sm:$0xff] (!%p2134_p6) }
  0x54   : > { %v561_v16 = vld [vmem:[#allocation4 + $0xb8] sm:$0xff] (!%p2134_p6)  ;;  %2210 = vmatprep.subr.bf16.mxu1 (!%p2134_p6), %v2209_v9  ;;  %2196 = vmatpush1.bf16.msra.mxu0 (!%p2134_p6), %v2195_v10  ;;  %v2197_v18 = vpack.c.bf16 (!%p2134_p6), %v346_v15, %v344_v13  ;;  %v345_v21 = vld [vmem:[#allocation4 + $0x30] sm:$0xff] (!%p2134_p6)  ;;  %v562_v24 = vld [vmem:[#allocation4 + $0xc0] sm:$0xff] (!%p2134_p6) }
  0x55   : > { %v2213_v19 = vpack.c.bf16 (!%p2134_p6), %v563_v17, %v561_v16  ;;  %v560_v22 = vld [vmem:[#allocation4 + $0xb0] sm:$0xff] (!%p2134_p6)  ;;  %2212 = vmatpush1.bf16.msra.mxu1 (!%p2134_p6), %v2211_v14  ;;  %v2199_v23 = vpack.c.bf16 (!%p2134_p6), %v345_v21, %v343_v20  ;;  %v348_v25 = vld [vmem:[#allocation4 + $0x48] sm:$0xff] (!%p2134_p6)  ;;  %v350_v26 = vld [vmem:[#allocation4 + $0x58] sm:$0xff] (!%p2134_p6) }
  0x56   : > { %2198 = vmatprep.subr.bf16.mxu0 (!%p2134_p6), %v2197_v18  ;;  %v2215_v27 = vpack.c.bf16 (!%p2134_p6), %v562_v24, %v560_v22  ;;  %v2201_v28 = vpack.c.bf16 (!%p2134_p6), %v350_v26, %v348_v25  ;;  %v565_v29 = vld [vmem:[#allocation4 + $0xd8] sm:$0xff] (!%p2134_p6)  ;;  %v567_v30 = vld [vmem:[#allocation4 + $0xe8] sm:$0xff] (!%p2134_p6)  ;;  %v347_v31 = vld [vmem:[#allocation4 + $0x40] sm:$0xff] (!%p2134_p6) }
  0x57   : > { %2214 = vmatprep.subr.bf16.mxu1 (!%p2134_p6), %v2213_v19  ;;  %v2217_v32 = vpack.c.bf16 (!%p2134_p6), %v567_v30, %v565_v29  ;;  %v349_v33 = vld [vmem:[#allocation4 + $0x50] sm:$0xff] (!%p2134_p6)  ;;  %v566_v35 = vld [vmem:[#allocation4 + $0xe0] sm:$0xff] (!%p2134_p6)  ;;  %v352_v37 = vld [vmem:[#allocation4 + $0x68] sm:$0xff] (!%p2134_p6) }
  0x58   : > { %v564_v34 = vld [vmem:[#allocation4 + $0xd0] sm:$0xff]  ;;  %2200 = vmatpush1.bf16.msra.mxu0 %v2199_v23  ;;  %v2203_v36 = vpack.c.bf16 %v349_v33, %v347_v31  ;;  %v354_v38 = vld [vmem:[#allocation4 + $0x78] sm:$0xff]  ;;  %v571_v42 = vld [vmem:[#allocation4 + $0x108] sm:$0xff] }
  0x59   : > { %v569_v39 = vld [vmem:[#allocation4 + $0xf8] sm:$0xff]  ;;  %2216 = vmatpush1.bf16.msra.mxu1 %v2215_v27  ;;  %2202 = vmatprep.subr.bf16.mxu0 %v2201_v28  ;;  %v2219_v40 = vpack.c.bf16 %v566_v35, %v564_v34  ;;  %v2205_v41 = vpack.c.bf16 %v354_v38, %v352_v37  ;;  %v351_v43 = vld [vmem:[#allocation4 + $0x60] sm:$0xff]  ;;  %v353_v44 = vld [vmem:[#allocation4 + $0x70] sm:$0xff] }
  0x5a   : > { %2218 = vmatprep.subr.bf16.mxu1 %v2217_v32  ;;  %v2221_v45 = vpack.c.bf16 %v571_v42, %v569_v39  ;;  %v568_v46 = vld [vmem:[#allocation4 + $0xf0] sm:$0xff]  ;;  %v570_v47 = vld [vmem:[#allocation4 + $0x100] sm:$0xff]  ;;  %v2207_v48 = vpack.c.bf16 %v353_v44, %v351_v43  ;;  %v356_v50 = vld [vmem:[#allocation4 + $0x88] sm:$0xff] }
  0x5b   : > { %v2223_v49 = vpack.c.bf16 %v570_v47, %v568_v46  ;;  %v573_v51 = vld [vmem:[#allocation4 + $0x118] sm:$0xff]  ;;  %v355_v52 = vld [vmem:[#allocation4 + $0x80] sm:$0xff]  ;;  %v572_v53 = vld [vmem:[#allocation4 + $0x110] sm:$0xff] }
  0x5c   : > { %2204 = vmatpush1.bf16.msra.mxu0 %v2203_v36  ;;  %v334_v54 = vld [vmem:[%s3485_s1] sm:$0xff]  ;;  %v335_v55 = vld [vmem:[%s3485_s1 + $0x8] sm:$0xff]  ;;  %v336_v56 = vld [vmem:[%s3485_s1 + $0x10] sm:$0xff] }
  0x5d   : > { %2220 = vmatpush1.bf16.msra.mxu1 %v2219_v40  ;;  %2206 = vmatprep.subr.bf16.mxu0 %v2205_v41  ;;  %v337_v57 = vld [vmem:[%s3485_s1 + $0x18] sm:$0xff]  ;;  %v338_v58 = vld [vmem:[%s3485_s1 + $0x20] sm:$0xf] }
  0x5e   : > { %2222 = vmatprep.subr.bf16.mxu1 %v2221_v45 }
  0x60   : > { %2208 = vmatpush1.bf16.msra.mxu0 %v2207_v48 }
  0x61   : > { %2224 = vmatpush1.bf16.msra.mxu1 %v2223_v49  ;;  %389 = vmatprep.subr.mxu0 %v356_v50 }
  0x62   : > { %590 = vmatprep.subr.mxu1 %v573_v51 }
  0x64   : > { %390 = vmatpush1.msra.mxu0 %v355_v52 }
  0x65   : > { %591 = vmatpush1.msra.mxu1 %v572_v53  ;;  %2135 = vmatmul.mubr.msk.f32.vlgmr.msra.gmra.mrb[0].mxu0 %vm357_vm2, %v334_v54 }
  0x66   : > { %2140 = vmatmul.mubr.msk.f32.vlgmr.msra.gmra.mrb[0].mxu1 %vm357_vm2, %v334_v54  ;;  %443 = vmatprep.mubr.f32.mxu0 %v2649_v8 }
  0x67   : > { %644 = vmatprep.mubr.f32.mxu1 %v2649_v8 }
  0x69   : > { %2136 = vmatmul.mubr.msk.f32.gmra.mrb[2].mxu0 %vm357_vm2, %v335_v55 }
  0x6a   : > { %2141 = vmatmul.mubr.msk.f32.gmra.mrb[2].mxu1 %vm357_vm2, %v335_v55  ;;  %449 = vmatprep.mubr.f32.mxu0 %v2649_v8 }
  0x6b   : > { %650 = vmatprep.mubr.f32.mxu1 %v2649_v8 }
  0x6d   : > { %2137 = vmatmul.mubr.msk.f32.gmra.mrb[4].mxu0 %vm357_vm2, %v336_v56 }
  0x6e   : > { %455 = vmatprep.mubr.f32.mxu0 %v2649_v8  ;;  %2142 = vmatmul.mubr.msk.f32.gmra.mrb[4].mxu1 %vm357_vm2, %v336_v56 }
  0x6f   : > { %656 = vmatprep.mubr.f32.mxu1 %v2649_v8 }
  0x71   : > { %2138 = vmatmul.mubr.msk.f32.gmra.mrb[6].mxu0 %vm357_vm2, %v337_v57 }
  0x72   : > { %2143 = vmatmul.mubr.msk.f32.gmra.mrb[6].mxu1 %vm357_vm2, %v337_v57  ;;  %461 = vmatprep.mubr.f32.mxu0 %v2649_v8 }
  0x73   : > { %662 = vmatprep.mubr.f32.mxu1 %v2649_v8 }
  0x75   : > { %2139 = vmatmul.mubr.msk.f32.gmra.mrb[8].mxu0 %vm357_vm2, %v338_v58 }
  0x76   : > { %2144 = vmatmul.mubr.msk.f32.gmra.mrb[8].mxu1 %vm357_vm2, %v338_v58 }
 0x138   : > { %v439_v59 = vpop.f32.mrb[0].mxu0 }
 0x139   : > { %v640_v60 = vpop.f32.mrb[0].mxu1  ;;  %v441_v61 = vpop.f32.mrb[1].mxu0  ;;  %v514_v2 = vmul.f32 %v439_v59, %v439_v59 }
 0x13a   : > { %v710_v62 = vmul.f32 %v640_v60, %v640_v60  ;;  %v515_v63 = vmul.f32 %v441_v61, %v441_v61  ;;  %v642_v0 = vpop.f32.mrb[1].mxu1  ;;  %v474_v1 = vsel %vm473_vm3, %v441_v61, 0.0 }
 0x13b   : > { %v674_v3 = vsel %vm473_vm3, %v642_v0, 0.0  ;;  %v711_v4 = vmul.f32 %v642_v0, %v642_v0  ;;  %v475_v5 = vadd.f32 %v474_v1, %v439_v59 }
 0x13c   : > { %v445_v6 = vpop.f32.mrb[2].mxu0  ;;  %v524_v7 = vsel %vm473_vm3, %v515_v63, 0.0  ;;  %v675_v8 = vadd.f32 %v674_v3, %v640_v60 }
 0x13d   : > { %v516_v9 = vmul.f32 %v445_v6, %v445_v6  ;;  %v646_v10 = vpop.f32.mrb[2].mxu1  ;;  %476 = vadd.xlane.f32.xlu0 %v475_v5  ;;  %v447_v11 = vpop.f32.mrb[3].mxu0  ;;  %v525_v12 = vadd.f32 %v524_v7, %v514_v2  ;;  %v720_v13 = vsel %vm473_vm3, %v711_v4, 0.0 }
 0x13e   : > { %v712_v14 = vmul.f32 %v646_v10, %v646_v10  ;;  %v648_v15 = vpop.f32.mrb[3].mxu1  ;;  %v478_v16 = vsel %vm473_vm3, %v447_v11, 0.0  ;;  %v517_v17 = vmul.f32 %v447_v11, %v447_v11  ;;  %v2836_v18 = vadd.f32 %v720_v13, %v710_v62 }
 0x13f   : > { %v678_v19 = vsel %vm473_vm3, %v648_v15, 0.0  ;;  %v713_v20 = vmul.f32 %v648_v15, %v648_v15  ;;  %526 = vadd.xlane.f32.xlu1 %v525_v12  ;;  %v479_v21 = vadd.f32 %v478_v16, %v445_v6  ;;  %v468_v15 = vld [vmem:[#allocation2] sm:$0xff] }
 0x140   : > { %v451_v22 = vpop.f32.mrb[4].mxu0  ;;  %v679_v23 = vadd.f32 %v678_v19, %v646_v10  ;;  %v528_v24 = vsel %vm473_vm3, %v517_v17, 0.0  ;;  %v509_v17 = vld [vmem:[#allocation3] sm:$0xff] }
 0x141   : > { %v518_v25 = vmul.f32 %v451_v22, %v451_v22  ;;  %676 = vadd.xlane.f32.xlu0 %v675_v8  ;;  %v453_v26 = vpop.f32.mrb[5].mxu0  ;;  %v652_v27 = vpop.f32.mrb[4].mxu1  ;;  %v529_v28 = vadd.f32 %v528_v24, %v516_v9  ;;  %v724_v29 = vsel %vm473_vm3, %v713_v20, 0.0  ;;  %v469_v24 = vld [vmem:[#allocation2 + $0x8] sm:$0xff] }
 0x142   : > { %v482_v30 = vsel %vm473_vm3, %v453_v26, 0.0  ;;  %v519_v31 = vmul.f32 %v453_v26, %v453_v26  ;;  %v714_v32 = vmul.f32 %v652_v27, %v652_v27  ;;  %v654_v33 = vpop.f32.mrb[5].mxu1  ;;  %v725_v34 = vadd.f32 %v724_v29, %v712_v14  ;;  %v510_v29 = vld [vmem:[#allocation3 + $0x8] sm:$0xff] }
 0x143   : > { %680 = vadd.xlane.f32.xlu1 %v679_v23  ;;  %v483_v35 = vadd.f32 %v482_v30, %v451_v22  ;;  %v682_v36 = vsel %vm473_vm3, %v654_v33, 0.0  ;;  %v715_v37 = vmul.f32 %v654_v33, %v654_v33  ;;  %v511_v33 = vld [vmem:[#allocation3 + $0x10] sm:$0xff] }
 0x144   : > { %v457_v38 = vpop.f32.mrb[6].mxu0  ;;  %v532_v39 = vsel %vm473_vm3, %v519_v31, 0.0  ;;  %v683_v40 = vadd.f32 %v682_v36, %v652_v27 }
 0x145   : > { %480 = vadd.xlane.f32.xlu0 %v479_v21  ;;  %v520_v41 = vmul.f32 %v457_v38, %v457_v38  ;;  %v459_v42 = vpop.f32.mrb[7].mxu0  ;;  %v533_v43 = vadd.f32 %v532_v39, %v518_v25  ;;  %v658_v44 = vpop.f32.mrb[6].mxu1  ;;  %v728_v45 = vsel %vm473_vm3, %v715_v37, 0.0 }
 0x146   : > { %v486_v46 = vsel %vm473_vm3, %v459_v42, 0.0  ;;  %v521_v47 = vmul.f32 %v459_v42, %v459_v42  ;;  %v660_v48 = vpop.f32.mrb[7].mxu1  ;;  %v729_v49 = vadd.f32 %v728_v45, %v714_v32  ;;  %v716_v53 = vmul.f32 %v658_v44, %v658_v44 }
 0x147   : > { %484 = vadd.xlane.f32.xlu1 %v483_v35  ;;  %v686_v50 = vsel %vm473_vm3, %v660_v48, 0.0  ;;  %v717_v51 = vmul.f32 %v660_v48, %v660_v48  ;;  %v487_v52 = vadd.f32 %v486_v46, %v457_v38  ;;  %v471_v38 = vld [vmem:[#allocation2 + $0x18] sm:$0xff] }
 0x148   : > { %v463_v54 = vpop.f32.mrb[8].mxu0  ;;  %v536_v55 = vsel %vm473_vm3, %v521_v47, 0.0  ;;  %v687_v56 = vadd.f32 %v686_v50, %v658_v44 }
 0x149   : > { %530 = vadd.xlane.f32.xlu0 %v529_v28  ;;  %v491_v57 = vsel %vm490_vm4, %v463_v54, 0.0  ;;  %v522_v58 = vmul.f32 %v463_v54, %v463_v54  ;;  %v465_v59 = vpop.f32.mrb[9].mxu0  ;;  %v537_v60 = vadd.f32 %v536_v55, %v520_v41  ;;  %v664_v61 = vpop.f32.mrb[8].mxu1  ;;  %v732_v62 = vsel %vm473_vm3, %v717_v51, 0.0  ;;  %v512_v41 = vld [vmem:[#allocation3 + $0x18] sm:$0xff] }
 0x14a   : > { %v493_v63 = vsel %vm492_vm5, %v465_v59, 0.0  ;;  %v523_v0 = vmul.f32 %v465_v59, %v465_v59  ;;  %v690_v1 = vsel %vm490_vm4, %v664_v61, 0.0  ;;  %v718_v2 = vmul.f32 %v664_v61, %v664_v61  ;;  %v666_v3 = vpop.f32.mrb[9].mxu1  ;;  %v513_v51 = vld [vmem:[#allocation3 + $0x20] sm:$0xf] }
 0x14b   : > { %534 = vadd.xlane.f32.xlu1 %v533_v43  ;;  %v691_v4 = vsel %vm492_vm5, %v666_v3, 0.0  ;;  %v719_v5 = vmul.f32 %v666_v3, %v666_v3  ;;  %v494_v6 = vadd.f32 %v493_v63, %v491_v57  ;;  %v540_v7 = vsel %vm490_vm4, %v522_v58, 0.0 }
 0x14c   : > { %v541_v8 = vsel %vm492_vm5, %v523_v0, 0.0  ;;  %v692_v9 = vadd.f32 %v691_v4, %v690_v1  ;;  %v733_v10 = vadd.f32 %v732_v62, %v716_v53  ;;  %v736_v11 = vsel %vm490_vm4, %v718_v2, 0.0 }
 0x14d   : > { %684 = vadd.xlane.f32.xlu0 %v683_v40  ;;  %v542_v12 = vadd.f32 %v541_v8, %v540_v7  ;;  %v737_v13 = vsel %vm492_vm5, %v719_v5, 0.0 }
 0x14e   : > { %v738_v14 = vadd.f32 %v737_v13, %v736_v11 }
 0x14f   : > { %488 = vadd.xlane.f32.xlu1 %v487_v52 }
 0x151   : > { %538 = vadd.xlane.f32.xlu0 %v537_v60 }
 0x153   : > { %688 = vadd.xlane.f32.xlu1 %v687_v56 }
 0x155   : > { %495 = vadd.xlane.f32.xlu0 %v494_v6 }
 0x157   : > { %543 = vadd.xlane.f32.xlu1 %v542_v12 }
 0x159   : > { %693 = vadd.xlane.f32.xlu0 %v692_v9 }
 0x15b   : > { %722 = vadd.xlane.f32.xlu1 %v2836_v18  ;;  %v470_v18 = vld [vmem:[#allocation2 + $0x10] sm:$0xff] }
 0x15d   : > { %726 = vadd.xlane.f32.xlu0 %v725_v34 }
 0x15f   : > { %730 = vadd.xlane.f32.xlu1 %v729_v49  ;;  %v472_v49 = vld [vmem:[#allocation2 + $0x20] sm:$0xf] }
 0x161   : > { %734 = vadd.xlane.f32.xlu0 %v733_v10 }
 0x163   : > { %739 = vadd.xlane.f32.xlu1 %v738_v14 }
 0x1ca   : > { %v477_v16 = vpop.xlane.xlu0 %476 }
 0x1cb   : > { %v497_v19 = vadd.f32 %v477_v16, %v468_v15 }
 0x1cc   : > { %v527_v20 = vpop.xlane.xlu1 %526 }
 0x1cd   : > { %503 = vst.msk [vmem:[#allocation2] sm:$0xff] %vm502_vm6, %v497_v19  ;;  %v545_v21 = vadd.f32 %v527_v20, %v509_v17 }
 0x1ce   : > { %v677_v22 = vpop.xlane.xlu0 %676 }
 0x1cf   : > { %550 = vst.msk [vmem:[#allocation3] sm:$0xff] %vm502_vm6, %v545_v21 }
 0x1d0   : > { %v681_v23 = vpop.xlane.xlu1 %680 }
 0x1d2   : > { %v481_v25 = vpop.xlane.xlu0 %480 }
 0x1d3   : > { %v498_v26 = vadd.f32 %v481_v25, %v469_v24 }
 0x1d4   : > { %v669_v27 = vld [vmem:[#allocation2] sm:$0xff]  ;;  %v485_v28 = vpop.xlane.xlu1 %484 }
 0x1d5   : > { %v695_v30 = vadd.f32 %v677_v22, %v669_v27  ;;  %504 = vst.msk [vmem:[#allocation2 + $0x8] sm:$0xff] %vm502_vm6, %v498_v26  ;;  %v499_v31 = vadd.f32 %v485_v28, %v470_v18 }
 0x1d6   : > { %v531_v32 = vpop.xlane.xlu0 %530  ;;  %v705_v58 = vld [vmem:[#allocation3] sm:$0xff] }
 0x1d7   : > { %700 = vst.msk [vmem:[#allocation2] sm:$0xff] %vm502_vm6, %v695_v30  ;;  %505 = vst.msk [vmem:[#allocation2 + $0x10] sm:$0xff] %vm502_vm6, %v499_v31  ;;  %v546_v34 = vadd.f32 %v531_v32, %v510_v29 }
 0x1d8   : > { %v535_v35 = vpop.xlane.xlu1 %534 }
 0x1d9   : > { %551 = vst.msk [vmem:[#allocation3 + $0x8] sm:$0xff] %vm502_vm6, %v546_v34  ;;  %v547_v36 = vadd.f32 %v535_v35, %v511_v33 }
 0x1da   : > { %v685_v37 = vpop.xlane.xlu0 %684 }
 0x1db   : > { %552 = vst.msk [vmem:[#allocation3 + $0x10] sm:$0xff] %vm502_vm6, %v547_v36 }
 0x1dc   : > { %v670_v39 = vld [vmem:[#allocation2 + $0x8] sm:$0xff]  ;;  %v489_v40 = vpop.xlane.xlu1 %488 }
 0x1dd   : > { %v696_v42 = vadd.f32 %v681_v23, %v670_v39  ;;  %v500_v43 = vadd.f32 %v489_v40, %v471_v38 }
 0x1de   : > { %v671_v44 = vld [vmem:[#allocation2 + $0x10] sm:$0xff]  ;;  %v539_v45 = vpop.xlane.xlu0 %538 }
 0x1df   : > { %701 = vst.msk [vmem:[#allocation2 + $0x8] sm:$0xff] %vm502_vm6, %v696_v42  ;;  %v697_v46 = vadd.f32 %v685_v37, %v671_v44  ;;  %506 = vst.msk [vmem:[#allocation2 + $0x18] sm:$0xff] %vm502_vm6, %v500_v43  ;;  %v548_v47 = vadd.f32 %v539_v45, %v512_v41 }
 0x1e0   : > { %v689_v48 = vpop.xlane.xlu1 %688  ;;  %v706_v61 = vld [vmem:[#allocation3 + $0x8] sm:$0xff] }
 0x1e1   : > { %702 = vst.msk [vmem:[#allocation2 + $0x10] sm:$0xff] %vm502_vm6, %v697_v46  ;;  %553 = vst.msk [vmem:[#allocation3 + $0x18] sm:$0xff] %vm502_vm6, %v548_v47 }
 0x1e2   : > { %v496_v50 = vpop.xlane.xlu0 %495  ;;  %v707_v1 = vld [vmem:[#allocation3 + $0x10] sm:$0xff] }
 0x1e3   : > { %v501_v52 = vadd.f32 %v496_v50, %v472_v49 }
 0x1e4   : > { %v544_v53 = vpop.xlane.xlu1 %543 }
 0x1e5   : > { %508 = vst.msk [vmem:[#allocation2 + $0x20] sm:$0xf] %vm507_vm7, %v501_v52  ;;  %v549_v54 = vadd.f32 %v544_v53, %v513_v51 }
 0x1e6   : > { %v672_v55 = vld [vmem:[#allocation2 + $0x18] sm:$0xff]  ;;  %v694_v56 = vpop.xlane.xlu0 %693 }
 0x1e7   : > { %v698_v57 = vadd.f32 %v689_v48, %v672_v55  ;;  %554 = vst.msk [vmem:[#allocation3 + $0x20] sm:$0xf] %vm507_vm7, %v549_v54 }
 0x1e8   : > { %v723_v59 = vpop.xlane.xlu1 %722  ;;  %v708_v5 = vld [vmem:[#allocation3 + $0x18] sm:$0xff] }
 0x1e9   : > { %703 = vst.msk [vmem:[#allocation2 + $0x18] sm:$0xff] %vm502_vm6, %v698_v57  ;;  %v741_v60 = vadd.f32 %v723_v59, %v705_v58 }
 0x1ea   : > { %v727_v62 = vpop.xlane.xlu0 %726 }
 0x1eb   : > { %746 = vst.msk [vmem:[#allocation3] sm:$0xff] %vm502_vm6, %v741_v60  ;;  %v742_v63 = vadd.f32 %v727_v62, %v706_v61 }
 0x1ec   : > { %v673_v0 = vld [vmem:[#allocation2 + $0x20] sm:$0xf]  ;;  %v731_v2 = vpop.xlane.xlu1 %730 }
 0x1ed   : > { %v699_v3 = vadd.f32 %v694_v56, %v673_v0  ;;  %747 = vst.msk [vmem:[#allocation3 + $0x8] sm:$0xff] %vm502_vm6, %v742_v63  ;;  %v743_v4 = vadd.f32 %v731_v2, %v707_v1 }
 0x1ee   : > { %v735_v6 = vpop.xlane.xlu0 %734  ;;  %v709_v8 = vld [vmem:[#allocation3 + $0x20] sm:$0xf] }
 0x1ef   : > { %704 = vst.msk [vmem:[#allocation2 + $0x20] sm:$0xf] %vm507_vm7, %v699_v3  ;;  %v744_v7 = vadd.f32 %v735_v6, %v708_v5 }
 0x1f0   : > { %748 = vst.msk [vmem:[#allocation3 + $0x10] sm:$0xff] %vm502_vm6, %v743_v4  ;;  %v740_v9 = vpop.xlane.xlu1 %739 }
 0x1f1   : > { %749 = vst.msk [vmem:[#allocation3 + $0x18] sm:$0xff] %vm502_vm6, %v744_v7  ;;  %v745_v10 = vadd.f32 %v740_v9, %v709_v8 }
 0x1f3   : > { %750 = vst.msk [vmem:[#allocation3 + $0x20] sm:$0xf] %vm507_vm7, %v745_v10 }
 0x1f4 PF: > { %p2145_p4 = scmp.ne.s32.totalorder %s2634_s24, 1 }
 0x1f6   : > { %754 = sbr.rel (%p2145_p4) target bundleno = 2111 (0x83f), region = 68 }
 0x1fd   : > { %v2879_v11 = vld [vmem:[#allocation4 + $0x8] sm:$0xff]  ;;  %v2881_v12 = vld [vmem:[#allocation4 + $0x18] sm:$0xff]  ;;  %v2883_v13 = vld [vmem:[#allocation4] sm:$0xff]  ;;  %v3495_v19 = vmov 0.0   ;;  %v2651_v20 = vmov 0   ;;  %vm903_vm8 = vcmask 588800  }
 0x1fe   : > { %v2225_v14 = vpack.c.bf16 %v2881_v12, %v2879_v11  ;;  %v2887_v15 = vld [vmem:[#allocation4 + $0x10] sm:$0xff]  ;;  %v2889_v16 = vld [vmem:[#allocation4 + $0x28] sm:$0xff]  ;;  %v2891_v17 = vld [vmem:[#allocation4 + $0x38] sm:$0xff]  ;;  %983 = vmatprep.mubr.f32.mxu0 %v3495_v19  ;;  %2467 = vset.pattern.permute.xlu1 %v2651_v20  ;;  %vm1096_vm9 = vcmask 556032   ;;  %vm1086_vm10 = vcmask 1043456   ;;  %vm1103_vm11 = vcmask 551936  }
 0x1ff   : > { %v2227_v21 = vpack.c.bf16 %v2887_v15, %v2883_v13  ;;  %v2229_v22 = vpack.c.bf16 %v2891_v17, %v2889_v16  ;;  %v2898_v23 = vld [vmem:[#allocation4 + $0x20] sm:$0xff]  ;;  %v2900_v24 = vld [vmem:[#allocation4 + $0x30] sm:$0xff]  ;;  %v2902_v25 = vld [vmem:[#allocation4 + $0x48] sm:$0xff]  ;;  %2466 = vset.pattern.permute.xlu0 %v2651_v20  ;;  %vm1181_vm12 = vcmask 293888  }
 0x200   : > { %2226 = vmatprep.subr.bf16.mxu0 %v2225_v14  ;;  %v2904_v18 = vld [vmem:[#allocation4 + $0x58] sm:$0xff]  ;;  %v2231_v26 = vpack.c.bf16 %v2900_v24, %v2898_v23  ;;  %v2910_v28 = vld [vmem:[#allocation4 + $0x40] sm:$0xff]  ;;  %v2912_v29 = vld [vmem:[#allocation4 + $0x50] sm:$0xff] }
 0x201   : > { %2228 = vmatpush1.bf16.msra.mxu0 %v2227_v21  ;;  %v2233_v27 = vpack.c.bf16 %v2904_v18, %v2902_v25  ;;  %v2914_v30 = vld [vmem:[#allocation4 + $0x68] sm:$0xff]  ;;  %v2916_v31 = vld [vmem:[#allocation4 + $0x78] sm:$0xff]  ;;  %v2235_v33 = vpack.c.bf16 %v2912_v29, %v2910_v28  ;;  %v2920_v34 = vld [vmem:[#allocation4 + $0x60] sm:$0xff] }
 0x202   : > { %2230 = vmatprep.subr.bf16.mxu0 %v2229_v22  ;;  %v756_v32 = vld [vmem:[#allocation2 + $0x8] sm:$0xff]  ;;  %v766_v36 = vld [vmem:[#allocation3 + $0x8] sm:$0xff]  ;;  %v755_v37 = vld [vmem:[#allocation2] sm:$0xff]  ;;  %v2237_v38 = vpack.c.bf16 %v2916_v31, %v2914_v30 }
 0x203   : > { %v2922_v35 = vmul.f32 0.0025510204, %v756_v32  ;;  %v2926_v39 = vld [vmem:[#allocation4 + $0x70] sm:$0xff]  ;;  %v771_v40 = vmul.f32 0.0025510204, %v766_v36  ;;  %v765_v42 = vld [vmem:[#allocation3] sm:$0xff] }
 0x204   : > { %v2928_v41 = vmul.f32 0.0025510204, %v755_v37  ;;  %v770_v44 = vmul.f32 0.0025510204, %v765_v42  ;;  %v758_v45 = vld [vmem:[#allocation2 + $0x18] sm:$0xff]  ;;  %v768_v46 = vld [vmem:[#allocation3 + $0x18] sm:$0xff]  ;;  %v2239_v52 = vpack.c.bf16 %v2926_v39, %v2920_v34 }
 0x205   : > { %2232 = vmatpush1.bf16.msra.mxu0 %v2231_v26  ;;  %v776_v43 = vmul.f32 %v2922_v35, %v2922_v35  ;;  %v2934_v48 = vmul.f32 0.0025510204, %v758_v45  ;;  %v773_v49 = vmul.f32 0.0025510204, %v768_v46  ;;  %v757_v50 = vld [vmem:[#allocation2 + $0x10] sm:$0xff]  ;;  %v767_v51 = vld [vmem:[#allocation3 + $0x10] sm:$0xff] }
 0x206   : > { %2234 = vmatprep.subr.bf16.mxu0 %v2233_v27  ;;  %v775_v47 = vmul.f32 %v2928_v41, %v2928_v41  ;;  %v2938_v54 = vmul.f32 0.0025510204, %v757_v50  ;;  %v772_v55 = vmul.f32 0.0025510204, %v767_v51  ;;  %v2940_v56 = vld [vmem:[#allocation4 + $0x88] sm:$0xff]  ;;  %v2947_v5 = vld [vmem:[#allocation4 + $0x80] sm:$0xff] }
 0x207   : > { %v781_v53 = vsub.f32 %v771_v40, %v776_v43  ;;  %v778_v58 = vmul.f32 %v2934_v48, %v2934_v48  ;;  %v759_v59 = vld [vmem:[#allocation2 + $0x20] sm:$0xf]  ;;  %v769_v60 = vld [vmem:[#allocation3 + $0x20] sm:$0xf]  ;;  %v2975_v26 = vld [vmem:[%s3485_s1 + $0x10] sm:$0xff] }
 0x208   : > { %v780_v57 = vsub.f32 %v770_v44, %v775_v47  ;;  %v777_v62 = vmul.f32 %v2938_v54, %v2938_v54  ;;  %v764_v63 = vmul.f32 0.0025510204, %v759_v59  ;;  %v774_v0 = vmul.f32 0.0025510204, %v769_v60  ;;  %v2952_v7 = vld [vmem:[%s3485_s1] sm:$0xff]  ;;  %v2961_v14 = vld [vmem:[%s3485_s1 + $0x8] sm:$0xff] }
 0x209   : > { %2236 = vmatpush1.bf16.msra.mxu0 %v2235_v33  ;;  %v791_v61 = vadd.f32 1e-05, %v781_v53  ;;  %v783_v2 = vsub.f32 %v773_v49, %v778_v58  ;;  %v786_v20 = vld [vmem:[%s3486_s2 + $0x8] sm:$0xff]  ;;  %v785_v21 = vld [vmem:[%s3486_s2] sm:$0xff]  ;;  %v788_v33 = vld [vmem:[%s3486_s2 + $0x18] sm:$0xff] }
 0x20a   : > { %2238 = vmatprep.subr.bf16.mxu0 %v2237_v38  ;;  %v790_v1 = vadd.f32 1e-05, %v780_v57  ;;  %v782_v3 = vsub.f32 %v772_v55, %v777_v62  ;;  %v779_v4 = vmul.f32 %v764_v63, %v764_v63  ;;  %v787_v37 = vld [vmem:[%s3486_s2 + $0x10] sm:$0xff]  ;;  %v2989_v42 = vld [vmem:[%s3485_s1 + $0x18] sm:$0xff]  ;;  %v805_v45 = vld [vmem:[%s3487_s3] sm:$0xff] }
 0x20b   : > { %2468 = vrsqrt.f32 %v791_v61  ;;  %v793_v6 = vadd.f32 1e-05, %v783_v2  ;;  %v789_v47 = vld [vmem:[%s3486_s2 + $0x20] sm:$0xf]  ;;  %v806_v55 = vld [vmem:[%s3487_s3 + $0x8] sm:$0xff]  ;;  %v808_v61 = vld [vmem:[%s3487_s3 + $0x18] sm:$0xff] }
 0x20c   : > { %2470 = vrsqrt.f32 %v790_v1  ;;  %v792_v8 = vadd.f32 1e-05, %v782_v3  ;;  %v784_v9 = vsub.f32 %v774_v0, %v779_v4 }
 0x20d   : > { %2240 = vmatpush1.bf16.msra.mxu0 %v2239_v52  ;;  %2472 = vrsqrt.f32 %v793_v6 }
 0x20e   : > { %935 = vmatprep.subr.mxu0 %v2940_v56  ;;  %2474 = vrsqrt.f32 %v792_v8  ;;  %v794_v10 = vadd.f32 1e-05, %v784_v9 }
 0x210   : > { %2476 = vrsqrt.f32 %v794_v10 }
 0x211   : > { %936 = vmatpush1.msra.mxu0 %v2947_v5 }
 0x212   : > { %2146 = vmatmul.mubr.msk.f32.vlgmr.msra.gmra.mrb[0].mxu0 %vm903_vm8, %v2952_v7 }
 0x213   : > { %989 = vmatprep.mubr.f32.mxu0 %v3495_v19 }
 0x215   : > { %v2469_v22 = vpop.eup %2468 }
 0x216   : > { %2147 = vmatmul.mubr.msk.f32.gmra.mrb[2].mxu0 %vm903_vm8, %v2961_v14  ;;  %v2471_v27 = vpop.eup %2470  ;;  %v801_v32 = vmul.f32 %v2469_v22, %v786_v20 }
 0x217   : > { %995 = vmatprep.mubr.f32.mxu0 %v3495_v19  ;;  %v800_v36 = vmul.f32 %v2471_v27, %v785_v21  ;;  %v2473_v38 = vpop.eup %2472 }
 0x218   : > { %1021 = vperm.xlu1 %2467, %v801_v32   ;;  %v2475_v40 = vpop.eup %2474  ;;  %v803_v44 = vmul.f32 %v2473_v38, %v788_v33  ;;  %v811_v50 = vmul.f32 %v801_v32, %v2922_v35  ;;  %v807_v35 = vld [vmem:[%s3487_s3 + $0x10] sm:$0xff] }
 0x219   : > { %1016 = vperm.xlu0 %2466, %v800_v36   ;;  %v810_v43 = vmul.f32 %v800_v36, %v2928_v41  ;;  %v802_v46 = vmul.f32 %v2475_v40, %v787_v37  ;;  %v3005_v41 = vld [vmem:[%s3485_s1 + $0x20] sm:$0xf] }
 0x21a   : > { %2148 = vmatmul.mubr.msk.f32.gmra.mrb[4].mxu0 %vm903_vm8, %v2975_v26  ;;  %v2477_v49 = vpop.eup %2476  ;;  %v816_v57 = vsub.f32 %v806_v55, %v811_v50  ;;  %v813_v60 = vmul.f32 %v803_v44, %v2934_v48 }
 0x21b   : > { %1001 = vmatprep.mubr.f32.mxu0 %v3495_v19  ;;  %v815_v51 = vsub.f32 %v805_v45, %v810_v43  ;;  %v804_v52 = vmul.f32 %v2477_v49, %v789_v47  ;;  %v812_v53 = vmul.f32 %v802_v46, %v2938_v54  ;;  %v809_v54 = vld [vmem:[%s3487_s3 + $0x20] sm:$0xf] }
 0x21c   : > { %1031 = vperm.xlu1 %2467, %v803_v44   ;;  %v818_v0 = vsub.f32 %v808_v61, %v813_v60 }
 0x21d   : > { %1026 = vperm.xlu0 %2466, %v802_v46   ;;  %v814_v58 = vmul.f32 %v804_v52, %v764_v63  ;;  %v817_v59 = vsub.f32 %v807_v35, %v812_v53 }
 0x21e   : > { %2149 = vmatmul.mubr.msk.f32.gmra.mrb[6].mxu0 %vm903_vm8, %v2989_v42 }
 0x21f   : > { %1007 = vmatprep.mubr.f32.mxu0 %v3495_v19  ;;  %v819_v62 = vsub.f32 %v809_v54, %v814_v58 }
 0x220   : > { %1051 = vperm.xlu1 %2467, %v815_v51  }
 0x221   : > { %1036 = vperm.xlu0 %2466, %v804_v52  }
 0x222   : > { %2150 = vmatmul.mubr.msk.f32.gmra.mrb[8].mxu0 %vm903_vm8, %v3005_v41 }
 0x223   : > { %1279 = vmatprep.mubr.f32.mxu0 %v3495_v19 }
 0x224   : > { %1056 = vperm.xlu1 %2467, %v816_v57  }
 0x225   : > { %1061 = vperm.xlu0 %2466, %v817_v59  }
 0x228   : > { %1071 = vperm.xlu1 %2467, %v819_v62  }
 0x229   : > { %1066 = vperm.xlu0 %2466, %v818_v0  }
 0x297   : > { %v3026_v1 = vpop.permute.xlu1 %1021 }
 0x298   : > { %v3024_v63 = vpop.permute.xlu0 %1016 }
 0x29b   : > { %v3030_v2 = vpop.permute.xlu1 %1031 }
 0x29c   : > { %v3028_v48 = vpop.permute.xlu0 %1026 }
 0x29f   : > { %v3034_v10 = vpop.permute.xlu1 %1051 }
 0x2a0   : > { %v3032_v6 = vpop.permute.xlu0 %1036 }
 0x2a1   : > { %3536 = vst [vmem:[#allocation13_spill] sm:$0xff] %v3032_v6 }
 0x2a3   : > { %v3049_v45 = vpop.permute.xlu1 %1056 }
 0x2a4   : > { %v3038_v22 = vpop.permute.xlu0 %1061  ;;  %3537 = vst [vmem:[#allocation14_spill] sm:$0xff] %v3049_v45 }
 0x2a8   : > { %v3057_v53 = vpop.permute.xlu0 %1066 }
 0x2a9   : > { %3538 = vst [vmem:[#allocation15_spill] sm:$0xff] %v3057_v53 }
 0x2e5   : > { %v985_v3 = vpop.f32.mrb[0].mxu0 }
 0x2e6   : > { %v987_v4 = vpop.f32.mrb[1].mxu0  ;;  %v1039_v21 = vmul.f32 %v3024_v63, %v985_v3 }
 0x2e7   : > { %v1040_v20 = vmul.f32 %v3024_v63, %v987_v4  ;;  %v3067_v4 = vpop.permute.xlu1 %1071 }
 0x2e8   : > { %v1074_v40 = vadd.f32 %v3034_v10, %v1039_v21  ;;  %3539 = vst [vmem:[#allocation16_spill] sm:$0xff] %v3067_v4 }
 0x2e9   : > { %v991_v8 = vpop.f32.mrb[2].mxu0  ;;  %v3042_v36 = vadd.f32 %v3034_v10, %v1040_v20 }
 0x2ea   : > { %v993_v9 = vpop.f32.mrb[3].mxu0  ;;  %v1041_v43 = vmul.f32 %v3026_v1, %v991_v8 }
 0x2eb   : > { %v1042_v37 = vmul.f32 %v3026_v1, %v993_v9  ;;  %v1097_v52 = vsel %vm1096_vm9, %v3042_v36, -inf }
 0x2ec   : > { %v1076_v58 = vadd.f32 %v3049_v45, %v1041_v43 }
 0x2ed   : > { %v997_v27 = vpop.f32.mrb[4].mxu0  ;;  %v1077_v55 = vadd.f32 %v3049_v45, %v1042_v37 }
 0x2ee   : > { %v1043_v32 = vmul.f32 %v3028_v48, %v997_v27  ;;  %v999_v33 = vpop.f32.mrb[5].mxu0 }
 0x2ef   : > { %v1044_v38 = vmul.f32 %v3028_v48, %v999_v33  ;;  %v1098_v8 = vsel %vm1096_vm9, %v1077_v55, -inf }
 0x2f0   : > { %v1078_v44 = vadd.f32 %v3038_v22, %v1043_v32 }
 0x2f1   : > { %v3052_v46 = vadd.f32 %v3038_v22, %v1044_v38  ;;  %v1003_v47 = vpop.f32.mrb[6].mxu0 }
 0x2f2   : > { %v1084_v49 = vmax.f32 %v1074_v40, %v1078_v44  ;;  %v1045_v50 = vmul.f32 %v3030_v2, %v1003_v47  ;;  %v1005_v51 = vpop.f32.mrb[7].mxu0 }
 0x2f3   : > { %v1099_v35 = vsel %vm1096_vm9, %v3052_v46, -inf  ;;  %v1046_v57 = vmul.f32 %v3030_v2, %v1005_v51 }
 0x2f4   : > { %v1100_v59 = vmax.f32 %v1097_v52, %v1099_v35  ;;  %v1080_v60 = vadd.f32 %v3057_v53, %v1045_v50 }
 0x2f5   : > { %v1081_v54 = vadd.f32 %v3057_v53, %v1046_v57  ;;  %v1009_v61 = vpop.f32.mrb[8].mxu0 }
 0x2f6   : > { %v1085_v62 = vmax.f32 %v1076_v58, %v1080_v60  ;;  %v1047_v0 = vmul.f32 %v3032_v6, %v1009_v61  ;;  %v1011_v3 = vpop.f32.mrb[9].mxu0 }
 0x2f7   : > { %v1101_v9 = vsel %vm1096_vm9, %v1081_v54, -inf  ;;  %v1048_v20 = vmul.f32 %v3032_v6, %v1011_v3 }
 0x2f8   : > { %v1102_v21 = vmax.f32 %v1098_v8, %v1101_v9  ;;  %v1082_v27 = vadd.f32 %v3067_v4, %v1047_v0 }
 0x2f9   : > { %v1083_v32 = vadd.f32 %v3067_v4, %v1048_v20 }
 0x2fa   : > { %v1087_v33 = vsel %vm1086_vm10, %v1082_v27, -inf }
 0x2fb   : > { %v1088_v37 = vmax.f32 %v1084_v49, %v1087_v33  ;;  %v1104_v38 = vsel %vm1103_vm11, %v1083_v32, -inf }
 0x2fc   : > { %v1105_v43 = vmax.f32 %v1100_v59, %v1104_v38 }
 0x2fd   : > { %v1089_v47 = vmax.f32 %v1088_v37, %v1085_v62 }
 0x2fe   : > { %v1106_v50 = vmax.f32 %v1105_v43, %v1102_v21 }
 0x2ff   : > { %v1090_v51 = vrot.slane %v1089_v47, 4 }
 0x300   : > { %v1107_v52 = vrot.slane %v1106_v50, 4 }
 0x301   : > { %v1091_v35 = vmax.f32 %v1089_v47, %v1090_v51 }
 0x302   : > { %v1108_v57 = vmax.f32 %v1106_v50, %v1107_v52 }
 0x303   : > { %v1092_v61 = vrot.slane %v1091_v35, 2 }
 0x304   : > { %v1109_v3 = vrot.slane %v1108_v57, 2 }
 0x305   : > { %v1093_v8 = vmax.f32 %v1091_v35, %v1092_v61 }
 0x306   : > { %v1110_v9 = vmax.f32 %v1108_v57, %v1109_v3 }
 0x307   : > { %v1094_v0 = vrot.slane %v1093_v8, 1 }
 0x308   : > { %v1111_v19 = vrot.slane %v1110_v9, 1 }
 0x309   : > { %v1095_v6 = vmax.f32 %v1093_v8, %v1094_v0 }
 0x30a   : > { %v1112_v20 = vmax.f32 %v1110_v9, %v1111_v19 }
 0x30b   : > { %v1113_v4 = vsub.f32 %v1074_v40, %v1095_v6  ;;  %v1115_v53 = vsub.f32 %v1076_v58, %v1095_v6  ;;  %v1117_v49 = vsub.f32 %v1078_v44, %v1095_v6  ;;  %v1119_v33 = vsub.f32 %v1080_v60, %v1095_v6 }
 0x30c   : > { %v1121_v45 = vsub.f32 %v1082_v27, %v1095_v6  ;;  %v1114_v59 = vsub.f32 %v3042_v36, %v1112_v20  ;;  %v1116_v62 = vsub.f32 %v1077_v55, %v1112_v20  ;;  %v1118_v21 = vsub.f32 %v3052_v46, %v1112_v20 }
 0x30d   : > { %v1123_v37 = vmul.f32 1.442695, %v1113_v4  ;;  %v1127_v38 = vmul.f32 1.442695, %v1115_v53  ;;  %v1131_v43 = vmul.f32 1.442695, %v1117_v49  ;;  %v1120_v47 = vsub.f32 %v1081_v54, %v1112_v20 }
 0x30e   : > { %v1135_v50 = vmul.f32 1.442695, %v1119_v33  ;;  %v1122_v51 = vsub.f32 %v1083_v32, %v1112_v20  ;;  %v1139_v52 = vmul.f32 1.442695, %v1121_v45  ;;  %v1125_v19 = vmul.f32 1.442695, %v1114_v59 }
 0x30f   : > { %2478 = vpow2.f32 %v1123_v37  ;;  %v1129_v40 = vmul.f32 1.442695, %v1116_v62  ;;  %v1133_v44 = vmul.f32 1.442695, %v1118_v21  ;;  %v1137_v6 = vmul.f32 1.442695, %v1120_v47 }
 0x310   : > { %2480 = vpow2.f32 %v1127_v38  ;;  %v1141_v36 = vmul.f32 1.442695, %v1122_v51 }
 0x311   : > { %2482 = vpow2.f32 %v1131_v43 }
 0x312   : > { %2484 = vpow2.f32 %v1135_v50 }
 0x313   : > { %2486 = vpow2.f32 %v1139_v52 }
 0x314   : > { %2488 = vpow2.f32 %v1125_v19 }
 0x315   : > { %2490 = vpow2.f32 %v1129_v40 }
 0x316   : > { %2492 = vpow2.f32 %v1133_v44 }
 0x317   : > { %2494 = vpow2.f32 %v1137_v6 }
 0x318   : > { %2496 = vpow2.f32 %v1141_v36 }
 0x319   : > { %v2479_v46 = vpop.eup %2478 }
 0x31a   : > { %v2481_v53 = vpop.eup %2480 }
 0x31b   : > { %v2483_v55 = vpop.eup %2482  ;;  %v1143_v58 = vadd.f32 %v2481_v53, %v2479_v46 }
 0x31c   : > { %v2485_v60 = vpop.eup %2484 }
 0x31d   : > { %v2487_v45 = vpop.eup %2486  ;;  %v1144_v54 = vadd.f32 %v2483_v55, %v1143_v58 }
 0x31e   : > { %v2489_v4 = vpop.eup %2488  ;;  %v1146_v61 = vsel %vm1086_vm10, %v2487_v45, 0.0 }
 0x31f   : > { %v2491_v27 = vpop.eup %2490  ;;  %v1145_v32 = vadd.f32 %v2485_v60, %v1144_v54  ;;  %v1154_v35 = vsel %vm1096_vm9, %v2489_v4, 0.0 }
 0x320   : > { %v2493_v57 = vpop.eup %2492  ;;  %v1155_v3 = vsel %vm1096_vm9, %v2491_v27, 0.0 }
 0x321   : > { %v2495_v8 = vpop.eup %2494  ;;  %v1147_v9 = vadd.f32 %v1146_v61, %v1145_v32  ;;  %v1156_v0 = vadd.f32 %v1155_v3, %v1154_v35  ;;  %v1157_v20 = vsel %vm1096_vm9, %v2493_v57, 0.0 }
 0x322   : > { %v2497_v49 = vpop.eup %2496  ;;  %v1159_v62 = vsel %vm1096_vm9, %v2495_v8, 0.0 }
 0x323   : > { %v1148_v33 = vrot.slane %v1147_v9, 4  ;;  %v1158_v59 = vadd.f32 %v1157_v20, %v1156_v0  ;;  %v1161_v38 = vsel %vm1103_vm11, %v2497_v49, 0.0 }
 0x325   : > { %v1149_v21 = vadd.f32 %v1148_v33, %v1147_v9  ;;  %v1160_v37 = vadd.f32 %v1159_v62, %v1158_v59 }
 0x327   : > { %v1150_v43 = vrot.slane %v1149_v21, 2  ;;  %v1162_v47 = vadd.f32 %v1161_v38, %v1160_v37 }
 0x329   : > { %v1151_v50 = vadd.f32 %v1150_v43, %v1149_v21  ;;  %v1163_v51 = vrot.slane %v1162_v47, 4 }
 0x32b   : > { %v1152_v52 = vrot.slane %v1151_v50, 1  ;;  %v1164_v19 = vadd.f32 %v1163_v51, %v1162_v47  ;;  %v838_v51 = vld [vmem:[#allocation7 + $0x18] sm:$0xff] }
 0x32d   : > { %v1153_v40 = vadd.f32 %v1152_v52, %v1151_v50  ;;  %v1165_v44 = vrot.slane %v1164_v19, 2  ;;  %v836_v50 = vld [vmem:[#allocation7 + $0x8] sm:$0xff]  ;;  %v835_v52 = vld [vmem:[#allocation7] sm:$0xff] }
 0x32f   : > { %2498 = vrcp.f32 %v1153_v40  ;;  %v1166_v6 = vadd.f32 %v1165_v44, %v1164_v19  ;;  %v3158_v19 = vpack.c.bf16 %v838_v51, %v836_v50  ;;  %v837_v40 = vld [vmem:[#allocation7 + $0x10] sm:$0xff]  ;;  %v840_v44 = vld [vmem:[#allocation7 + $0x28] sm:$0xff] }
 0x331   : > { %v1167_v36 = vrot.slane %v1166_v6, 1  ;;  %2266 = vmatprep.subr.bf16.mxu1 %v3158_v19 }
 0x333   : > { %v1168_v58 = vadd.f32 %v1167_v36, %v1166_v6  ;;  %v842_v6 = vld [vmem:[#allocation7 + $0x38] sm:$0xff]  ;;  %v3160_v36 = vpack.c.bf16 %v837_v40, %v835_v52  ;;  %v851_v52 = vld [vmem:[#allocation7 + $0x80] sm:$0xff]  ;;  %v853_v40 = vld [vmem:[#allocation7 + $0x90] sm:$0xff] }
 0x335   : > { %2500 = vrcp.f32 %v1168_v58  ;;  %v3162_v58 = vpack.c.bf16 %v842_v6, %v840_v44  ;;  %2268 = vmatpush1.bf16.msra.mxu1 %v3160_v36  ;;  %v856_v44 = vld [vmem:[#allocation7 + $0xa8] sm:$0xff]  ;;  %v858_v6 = vld [vmem:[#allocation7 + $0xb8] sm:$0xff] }
 0x337   : > { %2270 = vmatprep.subr.bf16.mxu1 %v3162_v58 }
 0x339   : > { %v2499_v54 = vpop.eup %2498 }
 0x33a   : > { %v1170_v32 = vmul.f32 %v2499_v54, %v2479_v46  ;;  %v1173_v35 = vmul.f32 %v2499_v54, %v2481_v53  ;;  %v1175_v61 = vmul.f32 %v2499_v54, %v2483_v55  ;;  %v1177_v3 = vmul.f32 %v2499_v54, %v2485_v60  ;;  %v3088_v46 = vld [vmem:[%s3488_s4] sm:$0xff]  ;;  %v3097_v55 = vld [vmem:[%s3488_s4 + $0x8] sm:$0xff]  ;;  %v3105_v60 = vld [vmem:[%s3488_s4 + $0x10] sm:$0xff] }
 0x33b   : > { %v1179_v9 = vmul.f32 %v2499_v54, %v2487_v45  ;;  %v3540_v53 = vmov 0.0   ;;  %v3113_v45 = vld [vmem:[%s3488_s4 + $0x18] sm:$0xff]  ;;  %v839_v54 = vld [vmem:[#allocation7 + $0x20] sm:$0xff] }
 0x33c   : > { %v2243_v0 = vpack.c.bf16 %v1173_v35, %v1170_v32  ;;  %v2247_v20 = vpack.c.bf16 %v1177_v3, %v1175_v61  ;;  %v841_v32 = vld [vmem:[#allocation7 + $0x30] sm:$0xff]  ;;  %v844_v35 = vld [vmem:[#allocation7 + $0x48] sm:$0xff]  ;;  %v846_v61 = vld [vmem:[#allocation7 + $0x58] sm:$0xff] }
 0x33d   : > { %v3166_v3 = vpack.c.bf16 %v841_v32, %v839_v54  ;;  %v3184_v54 = vpack.c.bf16 %v853_v40, %v851_v52  ;;  %v3187_v32 = vpack.c.bf16 %v858_v6, %v856_v44  ;;  %v863_v44 = vld [vmem:[#allocation7 + $0xe0] sm:$0xff]  ;;  %v865_v6 = vld [vmem:[#allocation7 + $0xf0] sm:$0xff] }
 0x33f   : > { %v2501_v33 = vpop.eup %2500  ;;  %2272 = vmatpush1.bf16.msra.mxu1 %v3166_v3 }
 0x340   : > { %v1172_v59 = vmul.f32 %v2501_v33, %v2489_v4  ;;  %v1174_v62 = vmul.f32 %v2501_v33, %v2491_v27  ;;  %v1176_v21 = vmul.f32 %v2501_v33, %v2493_v57  ;;  %v1178_v37 = vmul.f32 %v2501_v33, %v2495_v8  ;;  %v3121_v4 = vld [vmem:[%s3488_s4 + $0x20] sm:$0xff]  ;;  %v3129_v27 = vld [vmem:[%s3488_s4 + $0x28] sm:$0xff]  ;;  %v3137_v57 = vld [vmem:[%s3488_s4 + $0x30] sm:$0xff] }
 0x341   : > { %v1180_v38 = vmul.f32 %v2501_v33, %v2497_v49  ;;  %3541 = vst [vmem:[#allocation17_spill] sm:$0xff] %v3137_v57  ;;  %v3145_v8 = vld [vmem:[%s3488_s4 + $0x38] sm:$0xff]  ;;  %v3153_v49 = vld [vmem:[%s3488_s4 + $0x40] sm:$0xff] }
 0x342   : > { %v2241_v43 = vpack.c.bf16 %v1174_v62, %v1172_v59  ;;  %v2245_v47 = vpack.c.bf16 %v1178_v37, %v1176_v21  ;;  %3542 = vst [vmem:[#allocation18_spill] sm:$0xff] %v3145_v8  ;;  %3543 = vst [vmem:[#allocation19_spill] sm:$0xff] %v3153_v49  ;;  %v848_v33 = vld [vmem:[#allocation7 + $0x68] sm:$0xff]  ;;  %v850_v59 = vld [vmem:[#allocation7 + $0x78] sm:$0xff] }
 0x343   : > { %v3175_v21 = vpack.c.bf16 %v850_v59, %v848_v33  ;;  %v847_v37 = vld [vmem:[#allocation7 + $0x60] sm:$0xff] }
 0x344   : > { %2242 = vmatprep.subr.bf16.mxu0 %v2241_v43  ;;  %v852_v43 = vld [vmem:[#allocation7 + $0x88] sm:$0xff] }
 0x345   : > { %2244 = vmatpush1.bf16.msra.mxu0 %v2243_v0  ;;  %v843_v0 = vld [vmem:[#allocation7 + $0x40] sm:$0xff] }
 0x346   : > { %2246 = vmatprep.subr.bf16.mxu0 %v2245_v47  ;;  %v854_v47 = vld [vmem:[#allocation7 + $0x98] sm:$0xff] }
 0x347   : > { %v3181_v51 = vpack.c.bf16 %v854_v47, %v852_v43  ;;  %v864_v43 = vld [vmem:[#allocation7 + $0xe8] sm:$0xff]  ;;  %v866_v47 = vld [vmem:[#allocation7 + $0xf8] sm:$0xff] }
 0x348   : > { %v3199_v40 = vpack.c.bf16 %v866_v47, %v864_v43 }
 0x349   : > { %2248 = vmatpush1.bf16.msra.mxu0 %v2247_v20  ;;  %v845_v20 = vld [vmem:[#allocation7 + $0x50] sm:$0xff] }
 0x34a   : > { %2151 = vmatprep.subr.msk.mxu0 %vm1086_vm10, %v1180_v38  ;;  %v3172_v62 = vpack.c.bf16 %v845_v20, %v843_v0  ;;  %v849_v38 = vld [vmem:[#allocation7 + $0x70] sm:$0xff]  ;;  %v860_v0 = vld [vmem:[#allocation7 + $0xc8] sm:$0xff]  ;;  %v862_v20 = vld [vmem:[#allocation7 + $0xd8] sm:$0xff]  ;;  %3546 = vst [vmem:[#allocation22_spill] sm:$0xff] %v3199_v40 }
 0x34b   : > { %v3178_v50 = vpack.c.bf16 %v849_v38, %v847_v37  ;;  %v3193_v59 = vpack.c.bf16 %v862_v20, %v860_v0  ;;  %v859_v37 = vld [vmem:[#allocation7 + $0xc0] sm:$0xff]  ;;  %v861_v38 = vld [vmem:[#allocation7 + $0xd0] sm:$0xff]  ;;  %v3202_v0 = vpack.c.bf16 %v865_v6, %v863_v44  ;;  %v876_v44 = vld [vmem:[#allocation7 + $0x148] sm:$0xff] }
 0x34c   : > { %v3196_v52 = vpack.c.bf16 %v861_v38, %v859_v37  ;;  %v872_v37 = vld [vmem:[#allocation7 + $0x128] sm:$0xff]  ;;  %v874_v38 = vld [vmem:[#allocation7 + $0x138] sm:$0xff] }
 0x34d   : > { %2152 = vmatpush1.msk.msra.mxu0 %vm1086_vm10, %v1179_v9  ;;  %v3169_v9 = vpack.c.bf16 %v846_v61, %v844_v35  ;;  %v855_v35 = vld [vmem:[#allocation7 + $0xa0] sm:$0xff]  ;;  %v857_v61 = vld [vmem:[#allocation7 + $0xb0] sm:$0xff]  ;;  %3544 = vst [vmem:[#allocation20_spill] sm:$0xff] %v3193_v59  ;;  %3547 = vst [vmem:[#allocation23_spill] sm:$0xff] %v3202_v0  ;;  %v3211_v47 = vpack.c.bf16 %v874_v38, %v872_v37 }
 0x34e   : > { %2153 = vmatmul.mubr.msk.f32.vlgmr.msra.gmra.mrb[10].mxu0 %vm1181_vm12, %v3088_v46  ;;  %v3190_v33 = vpack.c.bf16 %v857_v61, %v855_v35  ;;  %3545 = vst [vmem:[#allocation21_spill] sm:$0xff] %v3196_v52  ;;  %v868_v35 = vld [vmem:[#allocation7 + $0x108] sm:$0xff]  ;;  %v870_v61 = vld [vmem:[#allocation7 + $0x118] sm:$0xff] }
 0x34f   : > { %1285 = vmatprep.mubr.f32.mxu0 %v3540_v53  ;;  %2274 = vmatprep.subr.bf16.mxu1 %v3169_v9  ;;  %v3205_v20 = vpack.c.bf16 %v870_v61, %v868_v35  ;;  %3550 = vst [vmem:[#allocation26_spill] sm:$0xff] %v3211_v47  ;;  %v878_v6 = vld [vmem:[#allocation7 + $0x158] sm:$0xff] }
 0x350   : > { %2276 = vmatpush1.bf16.msra.mxu1 %v3172_v62  ;;  %v3217_v61 = vpack.c.bf16 %v878_v6, %v876_v44 }
 0x351   : > { %2278 = vmatprep.subr.bf16.mxu1 %v3175_v21  ;;  %3548 = vst [vmem:[#allocation24_spill] sm:$0xff] %v3205_v20 }
 0x352   : > { %2154 = vmatmul.mubr.msk.f32.gmra.mrb[12].mxu0 %vm1181_vm12, %v3097_v55  ;;  %3552 = vst [vmem:[#allocation28_spill] sm:$0xff] %v3217_v61 }
 0x353   : > { %1291 = vmatprep.mubr.f32.mxu0 %v3540_v53 }
 0x354   : > { %2280 = vmatpush1.bf16.msra.mxu1 %v3178_v50 }
 0x355   : > { %2282 = vmatprep.subr.bf16.mxu1 %v3181_v51 }
 0x356   : > { %2155 = vmatmul.mubr.msk.f32.gmra.mrb[14].mxu0 %vm1181_vm12, %v3105_v60 }
 0x357   : > { %1297 = vmatprep.mubr.f32.mxu0 %v3540_v53 }
 0x358   : > { %2284 = vmatpush1.bf16.msra.mxu1 %v3184_v54 }
 0x359   : > { %2286 = vmatprep.subr.bf16.mxu1 %v3187_v32 }
 0x35a   : > { %2156 = vmatmul.mubr.msk.f32.gmra.mrb[16].mxu0 %vm1181_vm12, %v3113_v45 }
 0x35b   : > { %1303 = vmatprep.mubr.f32.mxu0 %v3540_v53 }
 0x35c   : > { %2288 = vmatpush1.bf16.msra.mxu1 %v3190_v33 }
 0x35d   : > { %2290 = vmatprep.subr.bf16.mxu1 %v3193_v59 }
 0x35e   : > { %2157 = vmatmul.mubr.msk.f32.gmra.mrb[18].mxu0 %vm1181_vm12, %v3121_v4 }
 0x35f   : > { %1309 = vmatprep.mubr.f32.mxu0 %v3540_v53 }
 0x360   : > { %2292 = vmatpush1.bf16.msra.mxu1 %v3196_v52  ;;  %v873_v52 = vld [vmem:[#allocation7 + $0x130] sm:$0xff] }
 0x361   : > { %2294 = vmatprep.subr.bf16.mxu1 %v3199_v40  ;;  %v875_v40 = vld [vmem:[#allocation7 + $0x140] sm:$0xff] }
 0x362   : > { %2158 = vmatmul.mubr.msk.f32.gmra.mrb[20].mxu0 %vm1181_vm12, %v3129_v27 }
 0x363   : > { %1315 = vmatprep.mubr.f32.mxu0 %v3540_v53 }
 0x364   : > { %2296 = vmatpush1.bf16.msra.mxu1 %v3202_v0  ;;  %v877_v0 = vld [vmem:[#allocation7 + $0x150] sm:$0xff] }
 0x365   : > { %2298 = vmatprep.subr.bf16.mxu1 %v3205_v20  ;;  %v3220_v37 = vpack.c.bf16 %v877_v0, %v875_v40  ;;  %v879_v20 = vld [vmem:[#allocation7 + $0x160] sm:$0xff] }
 0x366   : > { %2159 = vmatmul.mubr.msk.f32.gmra.mrb[22].mxu0 %vm1181_vm12, %v3137_v57  ;;  %v871_v57 = vld [vmem:[#allocation7 + $0x120] sm:$0xff] }
 0x367   : > { %1321 = vmatprep.mubr.f32.mxu0 %v3540_v53  ;;  %v3214_v35 = vpack.c.bf16 %v873_v52, %v871_v57  ;;  %3553 = vst [vmem:[#allocation29_spill] sm:$0xff] %v3220_v37 }
 0x369   : > { %3551 = vst [vmem:[#allocation27_spill] sm:$0xff] %v3214_v35 }
 0x36a   : > { %2160 = vmatmul.mubr.msk.f32.gmra.mrb[24].mxu0 %vm1181_vm12, %v3145_v8  ;;  %v869_v8 = vld [vmem:[#allocation7 + $0x110] sm:$0xff] }
 0x36b   : > { %1327 = vmatprep.mubr.f32.mxu0 %v3540_v53 }
 0x36e   : > { %2161 = vmatmul.mubr.msk.f32.gmra.mrb[26].mxu0 %vm1181_vm12, %v3153_v49  ;;  %v867_v49 = vld [vmem:[#allocation7 + $0x100] sm:$0xff] }
 0x36f   : > { %1419 = vmatprep.mubr.f32.mxu0 %v3540_v53  ;;  %v3208_v43 = vpack.c.bf16 %v869_v8, %v867_v49  ;;  %v880_v8 = vld [vmem:[#allocation7 + $0x168] sm:$0xff]  ;;  %v882_v49 = vld [vmem:[#allocation7 + $0x178] sm:$0xff] }
 0x370   : > { %v3223_v38 = vpack.c.bf16 %v882_v49, %v880_v8 }
 0x371   : > { %3549 = vst [vmem:[#allocation25_spill] sm:$0xff] %v3208_v43  ;;  %2300 = vmatpush1.bf16.msra.mxu1 %v3208_v43  ;;  %v881_v43 = vld [vmem:[#allocation7 + $0x170] sm:$0xff] }
 0x372   : > { %2302 = vmatprep.subr.bf16.mxu1 %v3211_v47  ;;  %3554 = vst [vmem:[#allocation30_spill] sm:$0xff] %v3223_v38  ;;  %v3226_v57 = vpack.c.bf16 %v881_v43, %v879_v20 }
 0x374   : > { %3555 = vst [vmem:[#allocation31_spill] sm:$0xff] %v3226_v57 }
 0x375   : > { %2304 = vmatpush1.bf16.msra.mxu1 %v3214_v35 }
 0x376   : > { %2306 = vmatprep.subr.bf16.mxu1 %v3217_v61 }
 0x379   : > { %2308 = vmatpush1.bf16.msra.mxu1 %v3220_v37 }
 0x37a   : > { %2310 = vmatprep.subr.bf16.mxu1 %v3223_v38 }
 0x37d   : > { %2312 = vmatpush1.bf16.msra.mxu1 %v3226_v57 }
 0x421   : > { %v1281_v52 = vpop.f32.mrb[10].mxu0 }
 0x422   : > { %v1283_v44 = vpop.f32.mrb[11].mxu0  ;;  %v1334_v40 = vmul.f32 %v1281_v52, %v2883_v13 }
 0x423   : > { %v1335_v8 = vmul.f32 %v1283_v44, %v2879_v11 }
 0x425   : > { %v1287_v6 = vpop.f32.mrb[12].mxu0 }
 0x426   : > { %v1336_v0 = vmul.f32 %v1287_v6, %v2887_v15  ;;  %v1289_v61 = vpop.f32.mrb[13].mxu0 }
 0x427   : > { %v1337_v49 = vmul.f32 %v1289_v61, %v2881_v12 }
 0x428   : > { %v2251_v35 = vpack.c.bf16 %v1336_v0, %v1334_v40 }
 0x429   : > { %v2249_v37 = vpack.c.bf16 %v1337_v49, %v1335_v8  ;;  %v1293_v20 = vpop.f32.mrb[14].mxu0 }
 0x42a   : > { %v1295_v43 = vpop.f32.mrb[15].mxu0  ;;  %v1338_v57 = vmul.f32 %v1293_v20, %v2898_v23  ;;  %v3246_v20 = vld [vmem:[#allocation4 + $0x98] sm:$0xff] }
 0x42b   : > { %2250 = vmatprep.subr.bf16.mxu0 %v2249_v37  ;;  %v1339_v13 = vmul.f32 %v1295_v43, %v2889_v16  ;;  %v3248_v43 = vld [vmem:[#allocation4 + $0xa8] sm:$0xff] }
 0x42c   : > { %2252 = vmatpush1.bf16.msra.mxu0 %v2251_v35 }
 0x42d   : > { %v1299_v38 = vpop.f32.mrb[16].mxu0 }
 0x42e   : > { %v1340_v47 = vmul.f32 %v1299_v38, %v2900_v24  ;;  %v1301_v59 = vpop.f32.mrb[17].mxu0 }
 0x42f   : > { %v1341_v15 = vmul.f32 %v1301_v59, %v2891_v17 }
 0x430   : > { %v2255_v52 = vpack.c.bf16 %v1340_v47, %v1338_v57 }
 0x431   : > { %v2253_v11 = vpack.c.bf16 %v1341_v15, %v1339_v13  ;;  %v1305_v44 = vpop.f32.mrb[18].mxu0  ;;  %v3251_v15 = vld [vmem:[#allocation4 + $0x90] sm:$0xff] }
 0x432   : > { %v1307_v12 = vpop.f32.mrb[19].mxu0  ;;  %v1342_v37 = vmul.f32 %v1305_v44, %v2910_v28 }
 0x433   : > { %2254 = vmatprep.subr.bf16.mxu0 %v2253_v11  ;;  %v1343_v23 = vmul.f32 %v1307_v12, %v2902_v25  ;;  %v3265_v11 = vld [vmem:[%s3489_s5] sm:$0xff] }
 0x434   : > { %2256 = vmatpush1.bf16.msra.mxu0 %v2255_v52  ;;  %3556 = vst [vmem:[#allocation32_spill] sm:$0xff] %v3265_v11  ;;  %v3271_v12 = vld [vmem:[#allocation4 + $0xb0] sm:$0xff] }
 0x435   : > { %v1311_v61 = vpop.f32.mrb[20].mxu0 }
 0x436   : > { %v1344_v35 = vmul.f32 %v1311_v61, %v2912_v29  ;;  %v1313_v6 = vpop.f32.mrb[21].mxu0  ;;  %v3273_v61 = vld [vmem:[#allocation4 + $0xc0] sm:$0xff] }
 0x437   : > { %v1345_v24 = vmul.f32 %v1313_v6, %v2904_v18 }
 0x438   : > { %v2259_v38 = vpack.c.bf16 %v1344_v35, %v1342_v37  ;;  %v3275_v37 = vld [vmem:[#allocation4 + $0xd8] sm:$0xff]  ;;  %v3277_v35 = vld [vmem:[#allocation4 + $0xe8] sm:$0xff] }
 0x439   : > { %v2257_v16 = vpack.c.bf16 %v1345_v24, %v1343_v23  ;;  %v1317_v40 = vpop.f32.mrb[22].mxu0  ;;  %3557 = vst [vmem:[#allocation33_spill] sm:$0xff] %v3275_v37  ;;  %3558 = vst [vmem:[#allocation34_spill] sm:$0xff] %v3277_v35  ;;  %v2321_v6 = vpack.c.bf16 %v3277_v35, %v3275_v37  ;;  %v3286_v23 = vld [vmem:[#allocation4 + $0xd0] sm:$0xff]  ;;  %v3288_v24 = vld [vmem:[#allocation4 + $0xe0] sm:$0xff] }
 0x43a   : > { %v1319_v17 = vpop.f32.mrb[23].mxu0  ;;  %v1346_v47 = vmul.f32 %v1317_v40, %v2920_v34  ;;  %v3253_v34 = vld [vmem:[#allocation4 + $0xa0] sm:$0xff]  ;;  %3559 = vst [vmem:[#allocation35_spill] sm:$0xff] %v3286_v23  ;;  %3560 = vst [vmem:[#allocation36_spill] sm:$0xff] %v3288_v24  ;;  %v2323_v40 = vpack.c.bf16 %v3288_v24, %v3286_v23 }
 0x43b   : > { %2258 = vmatprep.subr.bf16.mxu0 %v2257_v16  ;;  %v1347_v28 = vmul.f32 %v1319_v17, %v2914_v30  ;;  %v3257_v30 = vld [vmem:[#allocation4 + $0xc8] sm:$0xff] }
 0x43c   : > { %2260 = vmatpush1.bf16.msra.mxu0 %v2259_v38  ;;  %v3290_v38 = vld [vmem:[#allocation4 + $0xf8] sm:$0xff]  ;;  %v3292_v16 = vld [vmem:[#allocation4 + $0x108] sm:$0xff] }
 0x43d   : > { %v1323_v59 = vpop.f32.mrb[24].mxu0  ;;  %3561 = vst [vmem:[#allocation37_spill] sm:$0xff] %v3290_v38  ;;  %3562 = vst [vmem:[#allocation38_spill] sm:$0xff] %v3292_v16  ;;  %v2325_v17 = vpack.c.bf16 %v3292_v16, %v3290_v38 }
 0x43e   : > { %v1348_v57 = vmul.f32 %v1323_v59, %v2926_v39  ;;  %v1325_v0 = vpop.f32.mrb[25].mxu0  ;;  %v3255_v39 = vld [vmem:[#allocation4 + $0xb8] sm:$0xff]  ;;  %v3298_v59 = vld [vmem:[#allocation4 + $0xf0] sm:$0xff] }
 0x43f   : > { %v1349_v29 = vmul.f32 %v1325_v0, %v2916_v31  ;;  %v2313_v31 = vpack.c.bf16 %v3248_v43, %v3246_v20  ;;  %v2317_v44 = vpack.c.bf16 %v3257_v30, %v3255_v39  ;;  %3563 = vst [vmem:[#allocation39_spill] sm:$0xff] %v3298_v59  ;;  %v3304_v0 = vld [vmem:[#allocation4 + $0x118] sm:$0xff] }
 0x440   : > { %v2263_v8 = vpack.c.bf16 %v1348_v57, %v1346_v47  ;;  %v3300_v47 = vld [vmem:[#allocation4 + $0x100] sm:$0xff]  ;;  %3565 = vst [vmem:[#allocation41_spill] sm:$0xff] %v3304_v0 }
 0x441   : > { %v2261_v25 = vpack.c.bf16 %v1349_v29, %v1347_v28  ;;  %v1329_v49 = vpop.f32.mrb[26].mxu0  ;;  %3564 = vst [vmem:[#allocation40_spill] sm:$0xff] %v3300_v47  ;;  %v2327_v57 = vpack.c.bf16 %v3300_v47, %v3298_v59  ;;  %v3307_v28 = vld [vmem:[#allocation4 + $0x110] sm:$0xff] }
 0x442   : > { %v1331_v18 = vpop.f32.mrb[27].mxu0  ;;  %v1350_v52 = vmul.f32 %v1329_v49, %v2947_v5  ;;  %v2319_v5 = vpack.c.bf16 %v3273_v61, %v3271_v12  ;;  %3566 = vst [vmem:[#allocation42_spill] sm:$0xff] %v3307_v28 }
 0x443   : > { %2262 = vmatprep.subr.bf16.mxu0 %v2261_v25  ;;  %v1351_v13 = vmul.f32 %v1331_v18, %v2940_v56  ;;  %v2315_v56 = vpack.c.bf16 %v3253_v34, %v3251_v15 }
 0x444   : > { %2264 = vmatpush1.bf16.msra.mxu0 %v2263_v8 }
 0x445   : > { %1371 = vmatprep.subr.mxu0 %v1351_v13 }
 0x448   : > { %1372 = vmatpush1.msra.mxu0 %v1350_v52 }
 0x449   : > { %2314 = vmatprep.subr.bf16.mxu0 %v2313_v31  ;;  %2162 = vmatmul.mubr.msk.f32.vlgmr.msra.gmra.mrb[28].mxu0 %vm903_vm8, %v3265_v11 }
 0x44a   : > { %2316 = vmatpush1.bf16.msra.mxu0 %v2315_v56  ;;  %1591 = vmatprep.mubr.f32.mxu0 %v3540_v53 }
 0x44b   : > { %2318 = vmatprep.subr.bf16.mxu0 %v2317_v44 }
 0x44e   : > { %2320 = vmatpush1.bf16.msra.mxu0 %v2319_v5 }
 0x44f   : > { %2322 = vmatprep.subr.bf16.mxu0 %v2321_v6 }
 0x452   : > { %2324 = vmatpush1.bf16.msra.mxu0 %v2323_v40 }
 0x453   : > { %2326 = vmatprep.subr.bf16.mxu0 %v2325_v17 }
 0x456   : > { %2328 = vmatpush1.bf16.msra.mxu0 %v2327_v57 }
 0x457   : > { %1543 = vmatprep.subr.mxu0 %v3304_v0 }
 0x45a   : > { %1544 = vmatpush1.msra.mxu0 %v3307_v28 }
 0x45b   : > { %2166 = vmatmul.mubr.msk.f32.vlgmr.msra.gmra.mrb[30].mxu0 %vm903_vm8, %v2952_v7  ;;  %v3325_v7 = vld [vmem:[#allocation7 + $0x188] sm:$0xf] }
 0x45c   : > { %1597 = vmatprep.mubr.f32.mxu0 %v3540_v53  ;;  %2163 = vmatprep.subr.msk.mxu1 %vm1086_vm10, %v3325_v7 }
 0x45f   : > { %2167 = vmatmul.mubr.msk.f32.gmra.mrb[32].mxu0 %vm903_vm8, %v2961_v14  ;;  %v3327_v14 = vld [vmem:[#allocation7 + $0x180] sm:$0xf] }
 0x460   : > { %1603 = vmatprep.mubr.f32.mxu0 %v3540_v53  ;;  %2164 = vmatpush1.msk.msra.mxu1 %vm1086_vm10, %v3327_v14 }
 0x463   : > { %2168 = vmatmul.mubr.msk.f32.gmra.mrb[34].mxu0 %vm903_vm8, %v2975_v26 }
 0x464   : > { %1609 = vmatprep.mubr.f32.mxu0 %v3540_v53 }
 0x467   : > { %2169 = vmatmul.mubr.msk.f32.gmra.mrb[36].mxu0 %vm903_vm8, %v2989_v42 }
 0x468   : > { %1615 = vmatprep.mubr.f32.mxu0 %v3540_v53 }
 0x46b   : > { %2170 = vmatmul.mubr.msk.f32.gmra.mrb[38].mxu0 %vm903_vm8, %v3005_v41 }
 0x46c   : > { %1943 = vmatprep.mubr.f32.mxu0 %v3540_v53 }
 0x51c   : > { %v1421_v26 = vpop.f32.mrb[28].mxu0 }
 0x51d   : > { %v1423_v29 = vpop.f32.mrb[29].mxu0 }
 0x51e   : > { %2165 = vmatprep.mubr.msk.f32.mxu1 %vm1096_vm9, %v1423_v29 }
 0x51f   : > { %1500 = vmatmul.mubr.f32.vlgmr.msra.gmra.mrb[0].mxu1 %v1421_v26 }
 0x520   : > { %1806 = vmatprep.mubr.f32.mxu1 %v3540_v53 }
 0x52e   : > { %v1593_v42 = vpop.f32.mrb[30].mxu0 }
 0x52f   : > { %v1595_v41 = vpop.f32.mrb[31].mxu0  ;;  %v1622_v18 = vmul.f32 %v1593_v42, %v3024_v63 }
 0x530   : > { %v1623_v49 = vmul.f32 %v1595_v41, %v3024_v63 }
 0x531   : > { %v1632_v6 = vadd.f32 %v1622_v18, %v3034_v10  ;;  %v3568_v18 = vld [vmem:[#allocation15_spill] sm:$0xff] }
 0x532   : > { %v1599_v8 = vpop.f32.mrb[32].mxu0  ;;  %v3339_v56 = vadd.f32 %v1623_v49, %v3034_v10  ;;  %v3567_v49 = vld [vmem:[#allocation14_spill] sm:$0xff] }
 0x533   : > { %v1601_v25 = vpop.f32.mrb[33].mxu0  ;;  %v1624_v40 = vmul.f32 %v1599_v8, %v3026_v1 }
 0x534   : > { %v1625_v44 = vmul.f32 %v1601_v25, %v3026_v1  ;;  %v1653_v41 = vsel %vm1096_vm9, %v3339_v56, -inf }
 0x535   : > { %v1634_v1 = vadd.f32 %v1624_v40, %v3567_v49 }
 0x536   : > { %v1605_v13 = vpop.f32.mrb[34].mxu0  ;;  %v1635_v25 = vadd.f32 %v1625_v44, %v3567_v49 }
 0x537   : > { %v1626_v31 = vmul.f32 %v1605_v13, %v3028_v48  ;;  %v1607_v52 = vpop.f32.mrb[35].mxu0 }
 0x538   : > { %v1627_v5 = vmul.f32 %v1607_v52, %v3028_v48  ;;  %v1654_v28 = vsel %vm1096_vm9, %v1635_v25, -inf }
 0x539   : > { %v1636_v17 = vadd.f32 %v1626_v31, %v3038_v22 }
 0x53a   : > { %v1637_v57 = vadd.f32 %v1627_v5, %v3038_v22  ;;  %v1611_v63 = vpop.f32.mrb[36].mxu0  ;;  %v3569_v5 = vld [vmem:[#allocation13_spill] sm:$0xff] }
 0x53b   : > { %v1642_v26 = vmax.f32 %v1632_v6, %v1636_v17  ;;  %v1628_v29 = vmul.f32 %v1611_v63, %v3030_v2  ;;  %v1613_v42 = vpop.f32.mrb[37].mxu0 }
 0x53c   : > { %v1655_v48 = vsel %vm1096_vm9, %v1637_v57, -inf  ;;  %v1629_v10 = vmul.f32 %v1613_v42, %v3030_v2  ;;  %v3570_v2 = vld [vmem:[#allocation16_spill] sm:$0xff] }
 0x53d   : > { %v1656_v8 = vmax.f32 %v1653_v41, %v1655_v48  ;;  %v1638_v13 = vadd.f32 %v1628_v29, %v3568_v18 }
 0x53e   : > { %v1639_v22 = vadd.f32 %v1629_v10, %v3568_v18  ;;  %v1617_v31 = vpop.f32.mrb[38].mxu0 }
 0x53f   : > { %v1643_v52 = vmax.f32 %v1634_v1, %v1638_v13  ;;  %v1630_v63 = vmul.f32 %v1617_v31, %v3569_v5  ;;  %v1619_v11 = vpop.f32.mrb[39].mxu0 }
 0x540   : > { %v1657_v44 = vsel %vm1096_vm9, %v1639_v22, -inf  ;;  %v1631_v0 = vmul.f32 %v1619_v11, %v3569_v5 }
 0x541   : > { %v1658_v16 = vmax.f32 %v1654_v28, %v1657_v44  ;;  %v1640_v42 = vadd.f32 %v1630_v63, %v3570_v2 }
 0x542   : > { %v1641_v40 = vadd.f32 %v1631_v0, %v3570_v2 }
 0x543   : > { %v1644_v29 = vsel %vm1086_vm10, %v1640_v42, -inf }
 0x544   : > { %v1645_v41 = vmax.f32 %v1642_v26, %v1644_v29  ;;  %v1659_v49 = vsel %vm1103_vm11, %v1641_v40, -inf }
 0x545   : > { %v1660_v48 = vmax.f32 %v1656_v8, %v1659_v49 }
 0x546   : > { %v1646_v10 = vmax.f32 %v1645_v41, %v1643_v52 }
 0x547   : > { %v1661_v18 = vmax.f32 %v1660_v48, %v1658_v16 }
 0x548   : > { %v1647_v31 = vrot.slane %v1646_v10, 4 }
 0x549   : > { %v1662_v38 = vrot.slane %v1661_v18, 4 }
 0x54a   : > { %v1648_v47 = vmax.f32 %v1646_v10, %v1647_v31 }
 0x54b   : > { %v1663_v59 = vmax.f32 %v1661_v18, %v1662_v38 }
 0x54c   : > { %v1649_v35 = vrot.slane %v1648_v47, 2 }
 0x54d   : > { %v1664_v37 = vrot.slane %v1663_v59, 2 }
 0x54e   : > { %v1650_v11 = vmax.f32 %v1648_v47, %v1649_v35 }
 0x54f   : > { %v1665_v28 = vmax.f32 %v1663_v59, %v1664_v37 }
 0x550   : > { %v1651_v5 = vrot.slane %v1650_v11, 1 }
 0x551   : > { %v1666_v63 = vrot.slane %v1665_v28, 1 }
 0x552   : > { %v1652_v44 = vmax.f32 %v1650_v11, %v1651_v5 }
 0x553   : > { %v1667_v0 = vmax.f32 %v1665_v28, %v1666_v63 }
 0x554   : > { %v1668_v2 = vsub.f32 %v1632_v6, %v1652_v44  ;;  %v1670_v24 = vsub.f32 %v1634_v1, %v1652_v44  ;;  %v1672_v26 = vsub.f32 %v1636_v17, %v1652_v44  ;;  %v1674_v29 = vsub.f32 %v1638_v13, %v1652_v44 }
 0x555   : > { %v1676_v23 = vsub.f32 %v1640_v42, %v1652_v44  ;;  %v1673_v8 = vsub.f32 %v1637_v57, %v1667_v0  ;;  %v1675_v52 = vsub.f32 %v1639_v22, %v1667_v0  ;;  %v1677_v16 = vsub.f32 %v1641_v40, %v1667_v0 }
 0x556   : > { %v1678_v41 = vmul.f32 1.442695, %v1668_v2  ;;  %v1682_v49 = vmul.f32 1.442695, %v1670_v24  ;;  %v1669_v38 = vsub.f32 %v3339_v56, %v1667_v0  ;;  %v1686_v48 = vmul.f32 1.442695, %v1672_v26 }
 0x557   : > { %v1671_v10 = vsub.f32 %v1635_v25, %v1667_v0  ;;  %v1694_v37 = vmul.f32 1.442695, %v1676_v23  ;;  %v1690_v35 = vmul.f32 1.442695, %v1674_v29  ;;  %v1688_v59 = vmul.f32 1.442695, %v1673_v8 }
 0x558   : > { %2502 = vpow2.f32 %v1678_v41  ;;  %v1680_v47 = vmul.f32 1.442695, %v1669_v38  ;;  %v1692_v17 = vmul.f32 1.442695, %v1675_v52  ;;  %v1696_v57 = vmul.f32 1.442695, %v1677_v16 }
 0x559   : > { %2504 = vpow2.f32 %v1682_v49  ;;  %v1684_v6 = vmul.f32 1.442695, %v1671_v10 }
 0x55a   : > { %2506 = vpow2.f32 %v1686_v48 }
 0x55b   : > { %2508 = vpow2.f32 %v1694_v37 }
 0x55c   : > { %2510 = vpow2.f32 %v1690_v35 }
 0x55d   : > { %2512 = vpow2.f32 %v1688_v59 }
 0x55e   : > { %2514 = vpow2.f32 %v1680_v47 }
 0x55f   : > { %2516 = vpow2.f32 %v1684_v6 }
 0x560   : > { %2518 = vpow2.f32 %v1692_v17 }
 0x561   : > { %2520 = vpow2.f32 %v1696_v57 }
 0x562   : > { %v2503_v24 = vpop.eup %2502 }
 0x563   : > { %v2505_v1 = vpop.eup %2504 }
 0x564   : > { %v1698_v56 = vadd.f32 %v2505_v1, %v2503_v24  ;;  %v2507_v25 = vpop.eup %2506 }
 0x565   : > { %v2509_v23 = vpop.eup %2508 }
 0x566   : > { %v1699_v13 = vadd.f32 %v2507_v25, %v1698_v56  ;;  %v2511_v22 = vpop.eup %2510  ;;  %v1701_v18 = vsel %vm1086_vm10, %v2509_v23, 0.0 }
 0x567   : > { %v2513_v40 = vpop.eup %2512 }
 0x568   : > { %v1700_v42 = vadd.f32 %v2511_v22, %v1699_v13  ;;  %v2515_v31 = vpop.eup %2514  ;;  %v1712_v29 = vsel %vm1096_vm9, %v2513_v40, 0.0 }
 0x569   : > { %v2517_v28 = vpop.eup %2516  ;;  %v1709_v5 = vsel %vm1096_vm9, %v2515_v31, 0.0 }
 0x56a   : > { %v1702_v11 = vadd.f32 %v1701_v18, %v1700_v42  ;;  %v1710_v44 = vsel %vm1096_vm9, %v2517_v28, 0.0  ;;  %v2519_v0 = vpop.eup %2518 }
 0x56b   : > { %v1711_v2 = vadd.f32 %v1710_v44, %v1709_v5  ;;  %v2521_v8 = vpop.eup %2520  ;;  %v1714_v41 = vsel %vm1096_vm9, %v2519_v0, 0.0 }
 0x56c   : > { %v1703_v63 = vrot.slane %v1702_v11, 4  ;;  %v1716_v48 = vsel %vm1103_vm11, %v2521_v8, 0.0 }
 0x56d   : > { %v1713_v52 = vadd.f32 %v1712_v29, %v1711_v2 }
 0x56e   : > { %v1704_v26 = vadd.f32 %v1703_v63, %v1702_v11 }
 0x56f   : > { %v1715_v49 = vadd.f32 %v1714_v41, %v1713_v52 }
 0x570   : > { %v1705_v16 = vrot.slane %v1704_v26, 2 }
 0x571   : > { %v1717_v10 = vadd.f32 %v1716_v48, %v1715_v49 }
 0x572   : > { %v1706_v38 = vadd.f32 %v1705_v16, %v1704_v26 }
 0x573   : > { %v1718_v35 = vrot.slane %v1717_v10, 4 }
 0x574   : > { %v1707_v37 = vrot.slane %v1706_v38, 1 }
 0x575   : > { %v1719_v47 = vadd.f32 %v1718_v35, %v1717_v10 }
 0x576   : > { %v1708_v59 = vadd.f32 %v1707_v37, %v1706_v38 }
 0x577   : > { %v1720_v6 = vrot.slane %v1719_v47, 2 }
 0x578   : > { %2522 = vrcp.f32 %v1708_v59 }
 0x579   : > { %v1721_v17 = vadd.f32 %v1720_v6, %v1719_v47  ;;  %v3586_v6 = vld [vmem:[#allocation35_spill] sm:$0xff] }
 0x57b   : > { %v1722_v57 = vrot.slane %v1721_v17, 1 }
 0x57d   : > { %v1723_v56 = vadd.f32 %v1722_v57, %v1721_v17  ;;  %v3587_v57 = vld [vmem:[#allocation36_spill] sm:$0xff] }
 0x57f   : > { %2524 = vrcp.f32 %v1723_v56 }
 0x582   : > { %v2523_v13 = vpop.eup %2522 }
 0x583   : > { %v1725_v42 = vmul.f32 %v2523_v13, %v2503_v24  ;;  %v1728_v18 = vmul.f32 %v2523_v13, %v2505_v1  ;;  %v1730_v11 = vmul.f32 %v2523_v13, %v2507_v25  ;;  %v1732_v5 = vmul.f32 %v2523_v13, %v2511_v22 }
 0x584   : > { %v1734_v63 = vmul.f32 %v2523_v13, %v2509_v23 }
 0x585   : > { %v2331_v44 = vpack.c.bf16 %v1728_v18, %v1725_v42  ;;  %v2335_v2 = vpack.c.bf16 %v1732_v5, %v1730_v11 }
 0x589   : > { %v2525_v26 = vpop.eup %2524 }
 0x58a   : > { %v1727_v29 = vmul.f32 %v2525_v26, %v2515_v31  ;;  %v1729_v52 = vmul.f32 %v2525_v26, %v2517_v28  ;;  %v1731_v16 = vmul.f32 %v2525_v26, %v2513_v40  ;;  %v1733_v41 = vmul.f32 %v2525_v26, %v2519_v0 }
 0x58b   : > { %v1735_v49 = vmul.f32 %v2525_v26, %v2521_v8  ;;  %v3591_v26 = vld [vmem:[#allocation40_spill] sm:$0xff] }
 0x58c   : > { %v2329_v38 = vpack.c.bf16 %v1729_v52, %v1727_v29  ;;  %v2333_v48 = vpack.c.bf16 %v1733_v41, %v1731_v16  ;;  %v3592_v16 = vld [vmem:[#allocation37_spill] sm:$0xff] }
 0x58e   : > { %2330 = vmatprep.subr.bf16.mxu1 %v2329_v38 }
 0x58f   : > { %2332 = vmatpush1.bf16.msra.mxu1 %v2331_v44  ;;  %v3590_v44 = vld [vmem:[#allocation39_spill] sm:$0xff] }
 0x590   : > { %2334 = vmatprep.subr.bf16.mxu1 %v2333_v48 }
 0x593   : > { %2336 = vmatpush1.bf16.msra.mxu1 %v2335_v2 }
 0x594   : > { %2171 = vmatprep.subr.msk.mxu1 %vm1086_vm10, %v1735_v49  ;;  %v3593_v49 = vld [vmem:[#allocation38_spill] sm:$0xff] }
 0x597   : > { %2172 = vmatpush1.msk.msra.mxu1 %vm1086_vm10, %v1734_v63 }
 0x598   : > { %2173 = vmatmul.mubr.msk.f32.vlgmr.msra.gmra.mrb[2].mxu1 %vm1181_vm12, %v3088_v46  ;;  %2354 = vmatprep.subr.bf16.mxu1 %v3158_v19  ;;  %v3571_v46 = vld [vmem:[#allocation20_spill] sm:$0xff] }
 0x599   : > { %1812 = vmatprep.mubr.f32.mxu1 %v3540_v53  ;;  %2356 = vmatpush1.bf16.msra.mxu1 %v3160_v36  ;;  %v3577_v19 = vld [vmem:[#allocation24_spill] sm:$0xff]  ;;  %v3578_v36 = vld [vmem:[#allocation19_spill] sm:$0xff] }
 0x59a   : > { %2358 = vmatprep.subr.bf16.mxu1 %v3162_v58  ;;  %v3579_v58 = vld [vmem:[#allocation25_spill] sm:$0xff] }
 0x59c   : > { %2174 = vmatmul.mubr.msk.f32.gmra.mrb[4].mxu1 %vm1181_vm12, %v3097_v55  ;;  %v3572_v55 = vld [vmem:[#allocation17_spill] sm:$0xff] }
 0x59d   : > { %1818 = vmatprep.mubr.f32.mxu1 %v3540_v53  ;;  %2360 = vmatpush1.bf16.msra.mxu1 %v3166_v3  ;;  %v3580_v3 = vld [vmem:[#allocation26_spill] sm:$0xff] }
 0x59e   : > { %2362 = vmatprep.subr.bf16.mxu1 %v3169_v9  ;;  %v3581_v9 = vld [vmem:[#allocation27_spill] sm:$0xff] }
 0x5a0   : > { %2175 = vmatmul.mubr.msk.f32.gmra.mrb[6].mxu1 %vm1181_vm12, %v3105_v60  ;;  %v3573_v60 = vld [vmem:[#allocation21_spill] sm:$0xff] }
 0x5a1   : > { %1824 = vmatprep.mubr.f32.mxu1 %v3540_v53  ;;  %2364 = vmatpush1.bf16.msra.mxu1 %v3172_v62  ;;  %v3582_v62 = vld [vmem:[#allocation28_spill] sm:$0xff] }
 0x5a2   : > { %2366 = vmatprep.subr.bf16.mxu1 %v3175_v21  ;;  %v3583_v21 = vld [vmem:[#allocation29_spill] sm:$0xff] }
 0x5a4   : > { %2176 = vmatmul.mubr.msk.f32.gmra.mrb[8].mxu1 %vm1181_vm12, %v3113_v45  ;;  %v3574_v45 = vld [vmem:[#allocation22_spill] sm:$0xff] }
 0x5a5   : > { %1830 = vmatprep.mubr.f32.mxu1 %v3540_v53  ;;  %2368 = vmatpush1.bf16.msra.mxu1 %v3178_v50  ;;  %v3584_v50 = vld [vmem:[#allocation30_spill] sm:$0xff] }
 0x5a6   : > { %2370 = vmatprep.subr.bf16.mxu1 %v3181_v51 }
 0x5a8   : > { %2177 = vmatmul.mubr.msk.f32.gmra.mrb[10].mxu1 %vm1181_vm12, %v3121_v4  ;;  %v3575_v4 = vld [vmem:[#allocation18_spill] sm:$0xff] }
 0x5a9   : > { %1836 = vmatprep.mubr.f32.mxu1 %v3540_v53  ;;  %2372 = vmatpush1.bf16.msra.mxu1 %v3184_v54 }
 0x5aa   : > { %2374 = vmatprep.subr.bf16.mxu1 %v3187_v32 }
 0x5ac   : > { %2178 = vmatmul.mubr.msk.f32.gmra.mrb[12].mxu1 %vm1181_vm12, %v3129_v27  ;;  %v3576_v27 = vld [vmem:[#allocation23_spill] sm:$0xff] }
 0x5ad   : > { %1842 = vmatprep.mubr.f32.mxu1 %v3540_v53  ;;  %2376 = vmatpush1.bf16.msra.mxu1 %v3190_v33 }
 0x5ae   : > { %2378 = vmatprep.subr.bf16.mxu1 %v3571_v46 }
 0x5b0   : > { %2179 = vmatmul.mubr.msk.f32.gmra.mrb[14].mxu1 %vm1181_vm12, %v3572_v55 }
 0x5b1   : > { %1848 = vmatprep.mubr.f32.mxu1 %v3540_v53  ;;  %2380 = vmatpush1.bf16.msra.mxu1 %v3573_v60 }
 0x5b2   : > { %2382 = vmatprep.subr.bf16.mxu1 %v3574_v45  ;;  %v3594_v45 = vld [vmem:[#allocation41_spill] sm:$0xff] }
 0x5b4   : > { %2180 = vmatmul.mubr.msk.f32.gmra.mrb[16].mxu1 %vm1181_vm12, %v3575_v4 }
 0x5b5   : > { %1854 = vmatprep.mubr.f32.mxu1 %v3540_v53  ;;  %2384 = vmatpush1.bf16.msra.mxu1 %v3576_v27  ;;  %v3585_v53 = vld [vmem:[#allocation31_spill] sm:$0xff]  ;;  %v3595_v27 = vld [vmem:[#allocation42_spill] sm:$0xff] }
 0x5b6   : > { %2386 = vmatprep.subr.bf16.mxu1 %v3577_v19 }
 0x5b8   : > { %2181 = vmatmul.mubr.msk.f32.gmra.mrb[18].mxu1 %vm1181_vm12, %v3578_v36  ;;  %v3596_v36 = vld [vmem:[#allocation32_spill] sm:$0xff] }
 0x5b9   : > { %2388 = vmatpush1.bf16.msra.mxu1 %v3579_v58 }
 0x5ba   : > { %2390 = vmatprep.subr.bf16.mxu1 %v3580_v3 }
 0x5bd   : > { %2392 = vmatpush1.bf16.msra.mxu1 %v3581_v9 }
 0x5be   : > { %2394 = vmatprep.subr.bf16.mxu1 %v3582_v62 }
 0x5c1   : > { %2396 = vmatpush1.bf16.msra.mxu1 %v3583_v21 }
 0x5c2   : > { %2398 = vmatprep.subr.bf16.mxu1 %v3584_v50 }
 0x5c5   : > { %2400 = vmatpush1.bf16.msra.mxu1 %v3585_v53 }
 0x5c6   : > { %2183 = vmatprep.subr.msk.mxu1 %vm1086_vm10, %v3325_v7 }
 0x5c9   : > { %2184 = vmatpush1.msk.msra.mxu1 %vm1086_vm10, %v3327_v14 }
 0x5f2   : > { %v1501_v51 = vpop.f32.mrb[0].mxu1 }
 0x5f3   : > { %1506 = vst [vmem:[#allocation9] sm:$0xff] %v1501_v51  ;;  %v1503_v54 = vpop.f32.mrb[1].mxu1 }
 0x5f4   : > { %1507 = vst [vmem:[#allocation9 + $0x8] sm:$0xff] %v1503_v54 }
 0x66b   : > { %v1808_v32 = vpop.f32.mrb[2].mxu1 }
 0x66c   : > { %v1810_v33 = vpop.f32.mrb[3].mxu1  ;;  %v1861_v1 = vmul.f32 %v1808_v32, %v3251_v15 }
 0x66d   : > { %v1862_v22 = vmul.f32 %v1810_v33, %v3246_v20 }
 0x66f   : > { %v1814_v24 = vpop.f32.mrb[4].mxu1 }
 0x670   : > { %v1863_v25 = vmul.f32 %v1814_v24, %v3253_v34  ;;  %v1816_v23 = vpop.f32.mrb[5].mxu1 }
 0x671   : > { %v1864_v40 = vmul.f32 %v1816_v23, %v3248_v43 }
 0x672   : > { %v2339_v7 = vpack.c.bf16 %v1863_v25, %v1861_v1 }
 0x673   : > { %v2337_v31 = vpack.c.bf16 %v1864_v40, %v1862_v22  ;;  %v1820_v28 = vpop.f32.mrb[6].mxu1 }
 0x674   : > { %v1822_v14 = vpop.f32.mrb[7].mxu1  ;;  %v1865_v8 = vmul.f32 %v1820_v28, %v3271_v12  ;;  %v3588_v12 = vld [vmem:[#allocation33_spill] sm:$0xff] }
 0x675   : > { %2338 = vmatprep.subr.bf16.mxu0 %v2337_v31  ;;  %v1866_v15 = vmul.f32 %v1822_v14, %v3255_v39 }
 0x676   : > { %2340 = vmatpush1.bf16.msra.mxu0 %v2339_v7 }
 0x677   : > { %v1826_v0 = vpop.f32.mrb[8].mxu1 }
 0x678   : > { %v1867_v10 = vmul.f32 %v1826_v0, %v3273_v61  ;;  %v1828_v37 = vpop.f32.mrb[9].mxu1  ;;  %v3589_v61 = vld [vmem:[#allocation34_spill] sm:$0xff] }
 0x679   : > { %v1868_v34 = vmul.f32 %v1828_v37, %v3257_v30 }
 0x67a   : > { %v2343_v35 = vpack.c.bf16 %v1867_v10, %v1865_v8 }
 0x67b   : > { %v2341_v20 = vpack.c.bf16 %v1868_v34, %v1866_v15  ;;  %v1832_v59 = vpop.f32.mrb[10].mxu1 }
 0x67c   : > { %v1834_v43 = vpop.f32.mrb[11].mxu1  ;;  %v1869_v17 = vmul.f32 %v1832_v59, %v3586_v6 }
 0x67d   : > { %2342 = vmatprep.subr.bf16.mxu0 %v2341_v20  ;;  %v1870_v42 = vmul.f32 %v1834_v43, %v3588_v12 }
 0x67e   : > { %2344 = vmatpush1.bf16.msra.mxu0 %v2343_v35 }
 0x67f   : > { %v1838_v47 = vpop.f32.mrb[12].mxu1 }
 0x680   : > { %v1871_v56 = vmul.f32 %v1838_v47, %v3587_v57  ;;  %v1840_v13 = vpop.f32.mrb[13].mxu1 }
 0x681   : > { %v1872_v18 = vmul.f32 %v1840_v13, %v3589_v61 }
 0x682   : > { %v2347_v11 = vpack.c.bf16 %v1871_v56, %v1869_v17 }
 0x683   : > { %v2345_v39 = vpack.c.bf16 %v1872_v18, %v1870_v42  ;;  %v1844_v5 = vpop.f32.mrb[14].mxu1 }
 0x684   : > { %v1846_v30 = vpop.f32.mrb[15].mxu1  ;;  %v1873_v2 = vmul.f32 %v1844_v5, %v3590_v44 }
 0x685   : > { %2346 = vmatprep.subr.bf16.mxu0 %v2345_v39  ;;  %v1874_v41 = vmul.f32 %v1846_v30, %v3592_v16 }
 0x686   : > { %2348 = vmatpush1.bf16.msra.mxu0 %v2347_v11 }
 0x687   : > { %v1850_v63 = vpop.f32.mrb[16].mxu1 }
 0x688   : > { %v1875_v29 = vmul.f32 %v1850_v63, %v3591_v26  ;;  %v1852_v52 = vpop.f32.mrb[17].mxu1 }
 0x689   : > { %v1876_v38 = vmul.f32 %v1852_v52, %v3593_v49 }
 0x68a   : > { %v2351_v48 = vpack.c.bf16 %v1875_v29, %v1873_v2 }
 0x68b   : > { %v2349_v46 = vpack.c.bf16 %v1876_v38, %v1874_v41  ;;  %v1856_v55 = vpop.f32.mrb[18].mxu1 }
 0x68c   : > { %v1858_v60 = vpop.f32.mrb[19].mxu1  ;;  %v1877_v19 = vmul.f32 %v1856_v55, %v3595_v27 }
 0x68d   : > { %2350 = vmatprep.subr.bf16.mxu0 %v2349_v46  ;;  %v1878_v4 = vmul.f32 %v1858_v60, %v3594_v45 }
 0x68e   : > { %2352 = vmatpush1.bf16.msra.mxu0 %v2351_v48 }
 0x68f   : > { %1895 = vmatprep.subr.mxu0 %v1878_v4 }
 0x692   : > { %1896 = vmatpush1.msra.mxu0 %v1877_v19 }
 0x693   : > { %2182 = vmatmul.mubr.msk.f32.vlgmr.msra.gmra.mrb[40].mxu0 %vm903_vm8, %v3596_v36 }
 0x766   : > { %v1945_v58 = vpop.f32.mrb[40].mxu0 }
 0x767   : > { %v1947_v3 = vpop.f32.mrb[41].mxu0 }
 0x768   : > { %2185 = vmatprep.mubr.msk.f32.mxu1 %vm1096_vm9, %v1947_v3 }
 0x769   : > { %2018 = vmatmul.mubr.f32.vlgmr.msra.gmra.mrb[20].mxu1 %v1945_v58 }
 0x83c   : > { %v2019_v9 = vpop.f32.mrb[20].mxu1 }
 0x83d   : > { %2186 = vst [vmem:[#allocation9 + $0x10] sm:$0xff] %v2019_v9  ;;  %v2021_v62 = vpop.f32.mrb[21].mxu1 }
 0x83e   : > { %2187 = vst [vmem:[#allocation9 + $0x18] sm:$0xff] %v2021_v62 }
 0x83f PF: > { %p3450_p9 = scmp.eq.s32.totalorder %s2125_s27, 1  ;;  %s2652_s14 = smov [#allocation9]  }
 0x840   : > { %s2043_s15 = sshll.u32 %s2652_s14, 4  ;;  %s2044_s15 = int_to_ptr.vmem [resolvable:$true] %s2043_s15 }
 0x841   : > { %s2582_s16 = scalar_lea.vmem %s2044_s15, 512  ;;  %s2588_s24 = scalar_lea.vmem %s2044_s15, 1024 }
 0x842   : > { %p2583_p10 = scmp.ne.s32.totalorder %s2044_s15, %s2582_s16  ;;  %p2589_p13 = scmp.lt.s32.totalorder %s2044_s15, %s2044_s15 }
 0x843   : > { %p2590_p0 = scmp.lt.s32.totalorder %s2588_s24, %s2582_s16 }
 0x844   : > { %p2584_p11 = pnand %p2583_p10, %p3450_p9 }
 0x845   : > { %p2591_p1 = por %p2590_p0, %p2589_p13 }
 0x846   : > { %p2585_p12 = pneg %p2584_p11 }
 0x848   : > { %p2592_p2 = pnand %p2591_p1, %p2585_p12 }
 0x84a   : > { %2595 = shalt.err (!%p2592_p2)
}
 0x84b   : > { %s2596_s18 = scalar_lea.hbm %s3491_s7, 512 }
 0x84c   : > { %p2597_p5 = scmp.ne.s32.totalorder %s3491_s7, %s2596_s18  ;;  %p2602_p8 = scmp.lt.u32.totalorder %s2596_s18, %s3491_s7 }
 0x84e   : > { %p2598_p7 = pnand %p2597_p5, %p3450_p9 }
 0x850   : > { %p2599_p3 = pneg %p2598_p7 }
 0x852   : > { %p2604_p6 = pnand %p2602_p8, %p2599_p3 }
 0x854   : > { %2607 = shalt.err (!%p2604_p6)
}
 0x855   : > { %s2653_s9 = smov 256   ;;  %s2654_s30 = smov 16  }
 0x856   : > { %2410 = dma.vmem_to_hbm [thread:$0]  (%p3450_p9), %s2044_s15, 512, %s3491_s7, [#allocation6], %s2653_s9, %s2653_s9, %s2654_s30  }
 0x857 PF: > { %p2429_p4 = scmp.ge.s32.totalorder %s2642_s26, 2  ;;  %p2430_p10 = scmp.eq.s32.totalorder %s2126_s28, 1 }
 0x859   : > { %p2421_p11 = pnand %p2430_p10, %p2429_p4 }
 0x85b   : > { %2629 = dma.done.wait (!%p2421_p11), [#allocation6], 512  }
 0x85c   : > { %2631 = vsyncadd (!%p2421_p11), [#allocation6], 4294966784  ;;  %s22_s26 = sadd.s32 1, %s2642_s26   ;;  %s3598_s24 = smov %s2638_s25 }
 0x85d   : > { %p19_p12 = scmp.ge.s32.totalorder %s22_s26, 4   ;;  %s3599_s25 = smov %s3601_s29 }
 0x85f   :  { %21 = sbr.rel (!%p19_p12) target bundleno = 5 (0x5), region = 105 }
 0x866   :  { %2064 = vsyncpa [#allocation5], 1 }
 0x867   :  { %2066 = vsyncpa [#allocation5 + $0x1], 1 }
 0x868   :  { %2067 = vsyncpa [#allocation8], 1 }
 0x869   :  { %2068 = vsyncpa [#allocation6], 1 }
 0x86a   :  { %2070 = vsyncpa [#allocation6 + $0x1], 1 }

</bundles_post_ra>
